<compile_context>
chip_gen: v5e
topology: v5e:2x2
jax: 0.10.0
libtpu: 0.0.40
codegen_flags: <defaults>
</compile_context>

<pallas_src>
import functools

import jax
import jax.numpy as jnp
from jax.experimental import pallas as pl
from jax.experimental.pallas import tpu as pltpu


def _round_up(x, m):
    return ((x + m - 1) // m) * m


# ----------------------------------------------------------------------------
# Pallas kernel
# ----------------------------------------------------------------------------
def _posterior_encoder_kernel(
    # scalar prefetch (SMEM)
    offs_ref,          # (L, K) int32: tap start rows in the padded hidden scratch
    lens_ref,          # (B,)   int32: valid sequence lengths
    # inputs
    x_ref, noise_ref,
    wpre_ref, bpre_ref,
    wint_ref, wins_ref, bint_ref, bins_ref,
    wres_ref, bres_ref, wskip_ref, bskip_ref,
    wm_ref, bm_ref, wlogs_ref, blogs_ref,
    # output
    out_ref,           # (1, T, W_out) f32 slab: [z | m | logs | pad]
    # scratch
    hpad_ref,          # (pad_left + T + pad_right, H) f32 zero-padded hidden state
    skip_ref,          # (T, H) f32 skip accumulator
    *, hidden, out_ch, kernel_size, n_layers, T, pad_left,
):
    f32, bf16 = jnp.float32, jnp.bfloat16
    b = pl.program_id(0)
    layer = pl.program_id(1)

    # sequence mask built in-kernel from prefetched lengths (no mask stream)
    mask = (jax.lax.broadcasted_iota(jnp.int32, (T, 1), 0)
            < lens_ref[b]).astype(f32)                       # (T, 1)

    # ---- layer 0: pre 1x1 conv; init padded hidden state + skip accumulator
    @pl.when(layer == 0)
    def _init():
        h = (jnp.dot(x_ref[0], wpre_ref[...], preferred_element_type=f32)
             + bpre_ref[...]) * mask                          # (T, H) f32
        pad_right = hpad_ref.shape[0] - pad_left - T
        if pad_left > 0:                  # zero only the halos, not the interior
            hpad_ref[0:pad_left, :] = jnp.zeros((pad_left, hidden), f32)
        if pad_right > 0:
            hpad_ref[pad_left + T:, :] = jnp.zeros((pad_right, hidden), f32)
        hpad_ref[pad_left:pad_left + T, :] = h
        skip_ref[...] = jnp.zeros_like(skip_ref)

    # ---- WN layer `layer`: K accumulating (T,H)x(H,H) MXU dots per gate half
    wbase = layer * kernel_size
    xt = jnp.zeros((T, hidden), f32) + bint_ref[layer]        # tanh half
    xs = jnp.zeros((T, hidden), f32) + bins_ref[layer]        # sigmoid half
    for k in range(kernel_size):
        tap = hpad_ref[pl.ds(offs_ref[layer, k], T), :].astype(bf16)   # (T, H)
        xt = xt + jnp.dot(tap, wint_ref[wbase + k], preferred_element_type=f32)
        xs = xs + jnp.dot(tap, wins_ref[wbase + k], preferred_element_type=f32)

    # fused_add_tanh_sigmoid_multiply (g == 0)
    acts = (jnp.tanh(xt) * jax.nn.sigmoid(xs)).astype(bf16)   # (T, H)

    res = jnp.dot(acts, wres_ref[layer], preferred_element_type=f32) + bres_ref[layer]
    skp = jnp.dot(acts, wskip_ref[layer], preferred_element_type=f32) + bskip_ref[layer]

    # Uniform, branch-free update: the last layer's residual weights/bias are
    # packed as zeros, so the residual RMW is a no-op on the (dead) hidden
    # state there.  The RMW window is sublane-aligned (pad_left % 8 == 0).
    hpad_ref[pad_left:pad_left + T, :] = (
        hpad_ref[pad_left:pad_left + T, :] + res) * mask
    skip_ref[...] = skip_ref[...] + skp

    # ---- last layer: proj 1x1 conv (split halves) + reparameterization
    @pl.when(layer == n_layers - 1)
    def _final():
        o = (skip_ref[...] * mask).astype(bf16)               # (T, H)
        m = (jnp.dot(o, wm_ref[...], preferred_element_type=f32)
             + bm_ref[...]) * mask                            # (T, out_ch)
        logs = (jnp.dot(o, wlogs_ref[...], preferred_element_type=f32)
                + blogs_ref[...]) * mask                      # (T, out_ch)
        z = (m + noise_ref[0] * jnp.exp(logs)) * mask         # (T, out_ch) f32
        out_ref[0, :, 0:out_ch] = z
        out_ref[0, :, out_ch:2 * out_ch] = m
        out_ref[0, :, 2 * out_ch:3 * out_ch] = logs


# ----------------------------------------------------------------------------
# Parameter packing (PyTorch-layout params -> kernel-layout params)
# ----------------------------------------------------------------------------
def _pack_params(nat, *, hidden, out_ch, kernel_size, n_layers):
    pre_w, pre_b, in_w, in_b, rs_w, rs_b, proj_w, proj_b = nat
    f32, bf16 = jnp.float32, jnp.bfloat16

    wpre = pre_w.T.astype(bf16)                               # (Cin, H)
    bpre = pre_b[None, :].astype(f32)                         # (1, H)

    # (L, 2H, H, K) -> (L, K, H_in, 2H_out); split output halves (tanh | sig)
    win = jnp.transpose(in_w, (0, 3, 2, 1))
    wint = win[..., :hidden].reshape(
        n_layers * kernel_size, hidden, hidden).astype(bf16)
    wins = win[..., hidden:].reshape(
        n_layers * kernel_size, hidden, hidden).astype(bf16)
    bint = in_b[:, None, :hidden].astype(f32)                 # (L, 1, H)
    bins = in_b[:, None, hidden:].astype(f32)                 # (L, 1, H)

    wres = jnp.zeros((n_layers, hidden, hidden), f32)
    wskip = jnp.zeros((n_layers, hidden, hidden), f32)
    bres = jnp.zeros((n_layers, 1, hidden), f32)
    bskip = jnp.zeros((n_layers, 1, hidden), f32)
    for i in range(n_layers - 1):
        w = rs_w[i].T                                         # (H, 2H)
        wres = wres.at[i].set(w[:, :hidden])
        wskip = wskip.at[i].set(w[:, hidden:])
        bres = bres.at[i, 0].set(rs_b[i][:hidden])
        bskip = bskip.at[i, 0].set(rs_b[i][hidden:])
    # last layer: skip-only; residual half stays zero
    wskip = wskip.at[n_layers - 1].set(rs_w[n_layers - 1].T)
    bskip = bskip.at[n_layers - 1, 0].set(rs_b[n_layers - 1])

    wm = proj_w[:out_ch].T.astype(bf16)                       # (H, out_ch)
    wlogs = proj_w[out_ch:].T.astype(bf16)                    # (H, out_ch)
    bm = proj_b[None, :out_ch].astype(f32)
    blogs = proj_b[None, out_ch:].astype(f32)

    return (wpre, bpre, wint, wins, bint, bins,
            wres.astype(bf16), bres, wskip.astype(bf16), bskip,
            wm, bm, wlogs, blogs)


def _vmem_limit_bytes():
    # v5e/v6e (128 MiB physical) -> ~96 MiB; v7x (64 MiB) -> ~48 MiB.
    try:
        cap = int(pltpu.get_tpu_info().vmem_capacity_bytes)
    except Exception:
        cap = 64 * 1024 * 1024
    return max(32 * 1024 * 1024, min(96 * 1024 * 1024, (cap * 3) // 4))


# ----------------------------------------------------------------------------
# Wrapper
# ----------------------------------------------------------------------------
def posterior_encoder_forward(x_nct, x_lengths, noise_btc, nat_params, *,
                              hidden, out_ch, kernel_size, dilation_rate,
                              n_layers):
    B, Cin, T = x_nct.shape
    # channels-last; x hits the MXU as bf16 anyway -> cast at the boundary
    x_btc = jnp.transpose(x_nct, (0, 2, 1)).astype(jnp.bfloat16)   # (B, T, Cin)
    noise_btc = noise_btc.astype(jnp.float32)   # keep reparam math in f32
    lens = x_lengths.astype(jnp.int32)

    packed = _pack_params(nat_params, hidden=hidden, out_ch=out_ch,
                          kernel_size=kernel_size, n_layers=n_layers)

    # zero-padded hidden-state scratch geometry (sublane-aligned live window)
    dil = [dilation_rate ** i for i in range(n_layers)]
    pads = [(kernel_size * d - d) // 2 for d in dil]
    pad_left = _round_up(max(pads), 8) if max(pads) > 0 else 0
    pad_right_req = max((kernel_size - 1) * d - p for d, p in zip(dil, pads))
    pad_right = _round_up(pad_right_req, 8) if pad_right_req > 0 else 0
    # per-(layer, tap) start rows into the padded hidden-state scratch
    offs = jnp.array([[pad_left + k * d - p for k in range(kernel_size)]
                      for d, p in zip(dil, pads)], dtype=jnp.int32)   # (L, K)

    W_out = _round_up(3 * out_ch, 128)   # lane-dense output slab; sliced below
    LK = n_layers * kernel_size

    kernel = functools.partial(
        _posterior_encoder_kernel,
        hidden=hidden, out_ch=out_ch, kernel_size=kernel_size,
        n_layers=n_layers, T=T, pad_left=pad_left)

    batch3 = lambda shape: pl.BlockSpec(shape, lambda b, i, offs, lens: (b, 0, 0))
    const3 = lambda shape: pl.BlockSpec(shape, lambda b, i, offs, lens: (0, 0, 0))
    const2 = lambda shape: pl.BlockSpec(shape, lambda b, i, offs, lens: (0, 0))

    wbytes = sum(int(a.size) * a.dtype.itemsize for a in packed)
    cost = pl.CostEstimate(
        flops=int(2 * B * T * (Cin * hidden
                               + n_layers * kernel_size * hidden * 2 * hidden
                               + n_layers * hidden * 2 * hidden
                               + hidden * 2 * out_ch)),
        transcendentals=int(B * T * (2 * n_layers * hidden + out_ch)),
        bytes_accessed=int(x_btc.size * 2 + noise_btc.size * 4
                           + B * T * W_out * 4 + wbytes),
    )

    out = pl.pallas_call(
        kernel,
        out_shape=jax.ShapeDtypeStruct((B, T, W_out), jnp.float32),
        grid_spec=pltpu.PrefetchScalarGridSpec(
            num_scalar_prefetch=2,
            grid=(B, n_layers),
            in_specs=[
                batch3((1, T, Cin)),                  # x (bf16)
                batch3((1, T, out_ch)),               # noise (f32)
                const2((Cin, hidden)),                # wpre
                const2((1, hidden)),                  # bpre
                # VMEM-resident WN weight stack (constant index maps)
                const3((LK, hidden, hidden)),         # wint (tanh half)
                const3((LK, hidden, hidden)),         # wins (sigmoid half)
                const3((n_layers, 1, hidden)),        # bint
                const3((n_layers, 1, hidden)),        # bins
                const3((n_layers, hidden, hidden)),   # wres
                const3((n_layers, 1, hidden)),        # bres
                const3((n_layers, hidden, hidden)),   # wskip
                const3((n_layers, 1, hidden)),        # bskip
                const2((hidden, out_ch)),             # wm
                const2((1, out_ch)),                  # bm
                const2((hidden, out_ch)),             # wlogs
                const2((1, out_ch)),                  # blogs
            ],
            out_specs=pl.BlockSpec((1, T, W_out),
                                   lambda b, i, offs, lens: (b, 0, 0)),
            scratch_shapes=[
                pltpu.VMEM((pad_left + T + pad_right, hidden), jnp.float32),
                pltpu.VMEM((T, hidden), jnp.float32),
            ],
        ),
        compiler_params=pltpu.CompilerParams(
            dimension_semantics=("parallel", "arbitrary"),
            vmem_limit_bytes=_vmem_limit_bytes(),
        ),
        cost_estimate=cost,
    )(offs, lens, x_btc, noise_btc, *packed)

    z = out[..., :out_ch]
    m = out[..., out_ch:2 * out_ch]
    logs = out[..., 2 * out_ch:3 * out_ch]
    x_mask = (jnp.arange(T)[None, :] < x_lengths[:, None]
              ).astype(jnp.float32)[:, None, :]               # (B, 1, T)
    t = lambda a: jnp.transpose(a, (0, 2, 1))
    return t(z), t(m), t(logs), x_mask


# ----------------------------------------------------------------------------
# Pure-JAX reference (PyTorch semantics, matmul inputs in matching bf16)
# ----------------------------------------------------------------------------
def _reference(x_nct, x_lengths, noise_btc, nat, *, hidden, out_ch,
               kernel_size, dilation_rate, n_layers):
    pre_w, pre_b, in_w, in_b, rs_w, rs_b, proj_w, proj_b = nat
    B, Cin, T = x_nct.shape
    f32, bf16 = jnp.float32, jnp.bfloat16
    x = jnp.transpose(x_nct, (0, 2, 1)).astype(f32)
    mask = (jnp.arange(T)[None, :] < x_lengths[:, None]).astype(f32)[..., None]

    def dot(a, w):   # bf16-input matmul with f32 accumulation (matches kernel)
        return jnp.einsum("btc,cd->btd", a.astype(bf16), w.astype(bf16),
                          preferred_element_type=f32)

    def shift(h, off):
        if off == 0:
            return h
        if off > 0:
            return jnp.concatenate(
                [h[:, off:, :], jnp.zeros((B, off, hidden), h.dtype)], axis=1)
        o = -off
        return jnp.concatenate(
            [jnp.zeros((B, o, hidden), h.dtype), h[:, :T - o, :]], axis=1)

    h = (dot(x, pre_w.T) + pre_b[None, None, :]) * mask
    out = jnp.zeros((B, T, hidden), f32)
    for i in range(n_layers):
        d = dilation_rate ** i
        pad = (kernel_size * d - d) // 2
        x_in = jnp.zeros((B, T, 2 * hidden), f32) + in_b[i][None, None, :]
        for k in range(kernel_size):
            wk = jnp.transpose(in_w[i, :, :, k])          # (H, 2H)
            x_in = x_in + dot(shift(h, k * d - pad), wk)
        acts = jnp.tanh(x_in[..., :hidden]) * jax.nn.sigmoid(x_in[..., hidden:])
        rs = dot(acts, rs_w[i].T) + rs_b[i][None, None, :]
        if i < n_layers - 1:
            h = (h + rs[..., :hidden]) * mask
            out = out + rs[..., hidden:]
        else:
            out = out + rs                                 # last layer: H channels
    out = out * mask
    stats = (dot(out, proj_w.T) + proj_b[None, None, :]) * mask
    m = stats[..., :out_ch]
    logs = stats[..., out_ch:]
    z = (m + noise_btc * jnp.exp(logs)) * mask
    t = lambda a: jnp.transpose(a, (0, 2, 1))
    return t(z), t(m), t(logs), jnp.transpose(mask, (0, 2, 1))


# ----------------------------------------------------------------------------
# main
# ----------------------------------------------------------------------------
if __name__ == "__main__":
    # module config (small demo shapes)
    B, T = 2, 16
    in_channels, out_channels, hidden_channels = 8, 4, 16
    kernel_size, dilation_rate, n_layers = 5, 2, 3
    gin_channels = 0  # g=None path

    key = jax.random.PRNGKey(0)
    ks = jax.random.split(key, 16)

    H2 = 2 * hidden_channels
    # PyTorch-layout synthetic parameters (weight_norm at init == plain weight)
    pre_w = 0.2 * jax.random.normal(ks[0], (hidden_channels, in_channels), jnp.float32)
    pre_b = 0.1 * jax.random.normal(ks[1], (hidden_channels,), jnp.float32)
    in_w = 0.2 * jax.random.normal(
        ks[2], (n_layers, H2, hidden_channels, kernel_size), jnp.float32)
    in_b = 0.1 * jax.random.normal(ks[3], (n_layers, H2), jnp.float32)
    rs_w, rs_b = [], []
    for i in range(n_layers):
        rs_ch = H2 if i < n_layers - 1 else hidden_channels   # last layer: skip only
        rs_w.append(0.2 * jax.random.normal(ks[4 + i], (rs_ch, hidden_channels), jnp.float32))
        rs_b.append(0.1 * jax.random.normal(ks[8 + i], (rs_ch,), jnp.float32))
    proj_w = 0.2 * jax.random.normal(ks[12], (2 * out_channels, hidden_channels), jnp.float32)
    proj_b = 0.1 * jax.random.normal(ks[13], (2 * out_channels,), jnp.float32)
    nat_params = (pre_w, pre_b, in_w, in_b, rs_w, rs_b, proj_w, proj_b)

    # inputs
    x = jax.random.normal(ks[14], (B, in_channels, T), jnp.float32)   # PyTorch NCW
    x_lengths = jnp.array([16, 11], jnp.int32)
    # torch.randn_like(m) equivalent, generated host-side in channels-last layout
    noise = jax.random.normal(ks[15], (B, T, out_channels), jnp.float32)

    z, m, logs, x_mask = posterior_encoder_forward(
        x, x_lengths, noise, nat_params,
        hidden=hidden_channels, out_ch=out_channels,
        kernel_size=kernel_size, dilation_rate=dilation_rate, n_layers=n_layers)
    jax.block_until_ready((z, m, logs, x_mask))

    z_r, m_r, logs_r, mask_r = _reference(
        x, x_lengths, noise, nat_params,
        hidden=hidden_channels, out_ch=out_channels,
        kernel_size=kernel_size, dilation_rate=dilation_rate, n_layers=n_layers)

    assert z.shape == (B, out_channels, T) and x_mask.shape == (B, 1, T)
    # bf16 matmul inputs in both kernel and reference -> tolerance covers
    # accumulation-order / re-rounding drift only.
    for a, b in ((z, z_r), (m, m_r), (logs, logs_r), (x_mask, mask_r)):
        assert jnp.allclose(a, b, atol=1e-2, rtol=1e-2), "mismatch vs JAX reference"

    print("KERNEL_OK")
</pallas_src>

<mosaic_0001>
module attributes {stable_mosaic.version = 11 : i64} {
  func.func @_posterior_encoder_kernel(%arg0: i32, %arg1: i32, %arg2: memref<3x5xi32, #tpu.memory_space<smem>>, %arg3: memref<2xi32, #tpu.memory_space<smem>>, %arg4: memref<1x16x8xbf16, #tpu.memory_space<vmem>>, %arg5: memref<1x16x4xf32, #tpu.memory_space<vmem>>, %arg6: memref<8x16xbf16, #tpu.memory_space<vmem>>, %arg7: memref<1x16xf32, #tpu.memory_space<vmem>>, %arg8: memref<15x16x16xbf16, #tpu.memory_space<vmem>>, %arg9: memref<15x16x16xbf16, #tpu.memory_space<vmem>>, %arg10: memref<3x1x16xf32, #tpu.memory_space<vmem>>, %arg11: memref<3x1x16xf32, #tpu.memory_space<vmem>>, %arg12: memref<3x16x16xbf16, #tpu.memory_space<vmem>>, %arg13: memref<3x1x16xf32, #tpu.memory_space<vmem>>, %arg14: memref<3x16x16xbf16, #tpu.memory_space<vmem>>, %arg15: memref<3x1x16xf32, #tpu.memory_space<vmem>>, %arg16: memref<16x4xbf16, #tpu.memory_space<vmem>>, %arg17: memref<1x4xf32, #tpu.memory_space<vmem>>, %arg18: memref<16x4xbf16, #tpu.memory_space<vmem>>, %arg19: memref<1x4xf32, #tpu.memory_space<vmem>>, %arg20: memref<1x16x128xf32, #tpu.memory_space<vmem>>, %arg21: memref<32x16xf32, #tpu.memory_space<vmem>>, %arg22: memref<16x16xf32, #tpu.memory_space<vmem>>) attributes {dimension_semantics = [#tpu.dimension_semantics<parallel>, #tpu.dimension_semantics<arbitrary>], iteration_bounds = array<i64: 2, 3>, scalar_prefetch = 2 : i64, scratch_operands = 2 : i64, tpu.core_type = #tpu.core_type<tc>, window_params = [{transform_indices = @transform_0, window_bounds = array<i64: 1, 16, 8>}, {transform_indices = @transform_1, window_bounds = array<i64: 1, 16, 4>}, {pipeline_mode = #tpu.pipeline_mode<synchronous>, transform_indices = @transform_2, window_bounds = array<i64: 8, 16>}, {pipeline_mode = #tpu.pipeline_mode<synchronous>, transform_indices = @transform_3, window_bounds = array<i64: 1, 16>}, {pipeline_mode = #tpu.pipeline_mode<synchronous>, transform_indices = @transform_4, window_bounds = array<i64: 15, 16, 16>}, {pipeline_mode = #tpu.pipeline_mode<synchronous>, transform_indices = @transform_5, window_bounds = array<i64: 15, 16, 16>}, {pipeline_mode = #tpu.pipeline_mode<synchronous>, transform_indices = @transform_6, window_bounds = array<i64: 3, 1, 16>}, {pipeline_mode = #tpu.pipeline_mode<synchronous>, transform_indices = @transform_7, window_bounds = array<i64: 3, 1, 16>}, {pipeline_mode = #tpu.pipeline_mode<synchronous>, transform_indices = @transform_8, window_bounds = array<i64: 3, 16, 16>}, {pipeline_mode = #tpu.pipeline_mode<synchronous>, transform_indices = @transform_9, window_bounds = array<i64: 3, 1, 16>}, {pipeline_mode = #tpu.pipeline_mode<synchronous>, transform_indices = @transform_10, window_bounds = array<i64: 3, 16, 16>}, {pipeline_mode = #tpu.pipeline_mode<synchronous>, transform_indices = @transform_11, window_bounds = array<i64: 3, 1, 16>}, {pipeline_mode = #tpu.pipeline_mode<synchronous>, transform_indices = @transform_12, window_bounds = array<i64: 16, 4>}, {pipeline_mode = #tpu.pipeline_mode<synchronous>, transform_indices = @transform_13, window_bounds = array<i64: 1, 4>}, {pipeline_mode = #tpu.pipeline_mode<synchronous>, transform_indices = @transform_14, window_bounds = array<i64: 16, 4>}, {pipeline_mode = #tpu.pipeline_mode<synchronous>, transform_indices = @transform_15, window_bounds = array<i64: 1, 4>}, {transform_indices = @transform_16, window_bounds = array<i64: 1, 16, 128>}]} {
    %0 = tpu.iota {dimensions = array<i32: 0>} : vector<16x1xi32>
    %1 = arith.index_cast %arg0 : i32 to index
    %2 = memref.load %arg3[%1] : memref<2xi32, #tpu.memory_space<smem>>
    %3 = vector.broadcast %2 : i32 to vector<16x1xi32>
    %4 = arith.cmpi slt, %0, %3 : vector<16x1xi32>
    %5 = arith.extui %4 : vector<16x1xi1> to vector<16x1xi32>
    %6 = arith.sitofp %5 : vector<16x1xi32> to vector<16x1xf32>
    %c0_i32 = arith.constant 0 : i32
    %7 = arith.cmpi eq, %arg1, %c0_i32 : i32
    %8 = arith.extui %7 : i1 to i32
    %c0_i32_0 = arith.constant 0 : i32
    %9 = arith.cmpi ne, %8, %c0_i32_0 : i32
    scf.if %9 {
      %c0_67 = arith.constant 0 : index
      %c0_68 = arith.constant 0 : index
      %c0_69 = arith.constant 0 : index
      %145 = vector.load %arg4[%c0_67, %c0_68, %c0_69] : memref<1x16x8xbf16, #tpu.memory_space<vmem>>, vector<1x16x8xbf16>
      %146 = vector.shape_cast %145 : vector<1x16x8xbf16> to vector<16x8xbf16>
      %c0_70 = arith.constant 0 : index
      %c0_71 = arith.constant 0 : index
      %147 = vector.load %arg6[%c0_70, %c0_71] : memref<8x16xbf16, #tpu.memory_space<vmem>>, vector<8x16xbf16>
      %cst_72 = arith.constant dense<0.000000e+00> : vector<16x16xf32>
      %148 = tpu.matmul %146, %147, %cst_72 {dimension_numbers = #tpu.dot_dimension_numbers<[1], [0], [0], [1], [0, 0, 1, 1], [], []>} : vector<16x8xbf16>, vector<8x16xbf16>, vector<16x16xf32> -> vector<16x16xf32>
      %c0_73 = arith.constant 0 : index
      %c0_74 = arith.constant 0 : index
      %149 = vector.load %arg7[%c0_73, %c0_74] : memref<1x16xf32, #tpu.memory_space<vmem>>, vector<1x16xf32>
      %150 = vector.broadcast %149 : vector<1x16xf32> to vector<16x16xf32>
      %151 = arith.addf %148, %150 : vector<16x16xf32>
      %152 = vector.broadcast %6 : vector<16x1xf32> to vector<16x16xf32>
      %153 = arith.mulf %151, %152 : vector<16x16xf32>
      %cst_75 = arith.constant 0.000000e+00 : f32
      %154 = vector.broadcast %cst_75 : f32 to vector<8x16xf32>
      %c0_76 = arith.constant 0 : index
      %c0_77 = arith.constant 0 : index
      %155 = vector.load %arg21[%c0_76, %c0_77] : memref<32x16xf32, #tpu.memory_space<vmem>>, vector<8x16xf32>
      tpu.vector_store %arg21[%c0_76, %c0_77], %154 {strides = array<i32>} : memref<32x16xf32, #tpu.memory_space<vmem>>, vector<8x16xf32>,
      %cst_78 = arith.constant 0.000000e+00 : f32
      %156 = vector.broadcast %cst_78 : f32 to vector<8x16xf32>
      %c24 = arith.constant 24 : index
      %c0_79 = arith.constant 0 : index
      %157 = vector.load %arg21[%c24, %c0_79] : memref<32x16xf32, #tpu.memory_space<vmem>>, vector<8x16xf32>
      tpu.vector_store %arg21[%c24, %c0_79], %156 {strides = array<i32>} : memref<32x16xf32, #tpu.memory_space<vmem>>, vector<8x16xf32>,
      %c8_80 = arith.constant 8 : index
      %c0_81 = arith.constant 0 : index
      %158 = vector.load %arg21[%c8_80, %c0_81] : memref<32x16xf32, #tpu.memory_space<vmem>>, vector<16x16xf32>
      tpu.vector_store %arg21[%c8_80, %c0_81], %153 {strides = array<i32>} : memref<32x16xf32, #tpu.memory_space<vmem>>, vector<16x16xf32>,
      %cst_82 = arith.constant 0.000000e+00 : f32
      %159 = vector.broadcast %cst_82 : f32 to vector<16x16xf32>
      %c0_83 = arith.constant 0 : index
      %c0_84 = arith.constant 0 : index
      %160 = vector.load %arg22[%c0_83, %c0_84] : memref<16x16xf32, #tpu.memory_space<vmem>>, vector<16x16xf32>
      tpu.vector_store %arg22[%c0_83, %c0_84], %159 {strides = array<i32>} : memref<16x16xf32, #tpu.memory_space<vmem>>, vector<16x16xf32>,
    } else {
    }
    %c5_i32 = arith.constant 5 : i32
    %10 = arith.muli %arg1, %c5_i32 : i32
    %cst = arith.constant 0.000000e+00 : f32
    %11 = vector.broadcast %cst : f32 to vector<16x16xf32>
    %12 = arith.index_cast %arg1 : i32 to index
    %c0 = arith.constant 0 : index
    %c0_1 = arith.constant 0 : index
    %13 = vector.load %arg10[%12, %c0, %c0_1] : memref<3x1x16xf32, #tpu.memory_space<vmem>>, vector<1x1x16xf32>
    %14 = vector.shape_cast %13 : vector<1x1x16xf32> to vector<1x16xf32>
    %15 = vector.broadcast %14 : vector<1x16xf32> to vector<16x16xf32>
    %16 = arith.addf %11, %15 : vector<16x16xf32>
    %cst_2 = arith.constant 0.000000e+00 : f32
    %17 = vector.broadcast %cst_2 : f32 to vector<16x16xf32>
    %18 = arith.index_cast %arg1 : i32 to index
    %c0_3 = arith.constant 0 : index
    %c0_4 = arith.constant 0 : index
    %19 = vector.load %arg11[%18, %c0_3, %c0_4] : memref<3x1x16xf32, #tpu.memory_space<vmem>>, vector<1x1x16xf32>
    %20 = vector.shape_cast %19 : vector<1x1x16xf32> to vector<1x16xf32>
    %21 = vector.broadcast %20 : vector<1x16xf32> to vector<16x16xf32>
    %22 = arith.addf %17, %21 : vector<16x16xf32>
    %23 = arith.index_cast %arg1 : i32 to index
    %c0_5 = arith.constant 0 : index
    %24 = memref.load %arg2[%23, %c0_5] : memref<3x5xi32, #tpu.memory_space<smem>>
    %25 = arith.index_cast %24 : i32 to index
    %c0_6 = arith.constant 0 : index
    %26 = vector.load %arg21[%25, %c0_6] : memref<32x16xf32, #tpu.memory_space<vmem>>, vector<16x16xf32>
    %27 = arith.truncf %26 : vector<16x16xf32> to vector<16x16xbf16>
    %c0_i32_7 = arith.constant 0 : i32
    %28 = arith.addi %10, %c0_i32_7 : i32
    %29 = arith.index_cast %28 : i32 to index
    %c0_8 = arith.constant 0 : index
    %c0_9 = arith.constant 0 : index
    %30 = vector.load %arg8[%29, %c0_8, %c0_9] : memref<15x16x16xbf16, #tpu.memory_space<vmem>>, vector<1x16x16xbf16>
    %31 = vector.shape_cast %30 : vector<1x16x16xbf16> to vector<16x16xbf16>
    %cst_10 = arith.constant dense<0.000000e+00> : vector<16x16xf32>
    %32 = tpu.matmul %27, %31, %cst_10 {dimension_numbers = #tpu.dot_dimension_numbers<[1], [0], [0], [1], [0, 0, 1, 1], [], []>} : vector<16x16xbf16>, vector<16x16xbf16>, vector<16x16xf32> -> vector<16x16xf32>
    %33 = arith.addf %16, %32 : vector<16x16xf32>
    %c0_i32_11 = arith.constant 0 : i32
    %34 = arith.addi %10, %c0_i32_11 : i32
    %35 = arith.index_cast %34 : i32 to index
    %c0_12 = arith.constant 0 : index
    %c0_13 = arith.constant 0 : index
    %36 = vector.load %arg9[%35, %c0_12, %c0_13] : memref<15x16x16xbf16, #tpu.memory_space<vmem>>, vector<1x16x16xbf16>
    %37 = vector.shape_cast %36 : vector<1x16x16xbf16> to vector<16x16xbf16>
    %cst_14 = arith.constant dense<0.000000e+00> : vector<16x16xf32>
    %38 = tpu.matmul %27, %37, %cst_14 {dimension_numbers = #tpu.dot_dimension_numbers<[1], [0], [0], [1], [0, 0, 1, 1], [], []>} : vector<16x16xbf16>, vector<16x16xbf16>, vector<16x16xf32> -> vector<16x16xf32>
    %39 = arith.addf %22, %38 : vector<16x16xf32>
    %40 = arith.index_cast %arg1 : i32 to index
    %c1 = arith.constant 1 : index
    %41 = memref.load %arg2[%40, %c1] : memref<3x5xi32, #tpu.memory_space<smem>>
    %42 = arith.index_cast %41 : i32 to index
    %c0_15 = arith.constant 0 : index
    %43 = vector.load %arg21[%42, %c0_15] : memref<32x16xf32, #tpu.memory_space<vmem>>, vector<16x16xf32>
    %44 = arith.truncf %43 : vector<16x16xf32> to vector<16x16xbf16>
    %c1_i32 = arith.constant 1 : i32
    %45 = arith.addi %10, %c1_i32 : i32
    %46 = arith.index_cast %45 : i32 to index
    %c0_16 = arith.constant 0 : index
    %c0_17 = arith.constant 0 : index
    %47 = vector.load %arg8[%46, %c0_16, %c0_17] : memref<15x16x16xbf16, #tpu.memory_space<vmem>>, vector<1x16x16xbf16>
    %48 = vector.shape_cast %47 : vector<1x16x16xbf16> to vector<16x16xbf16>
    %cst_18 = arith.constant dense<0.000000e+00> : vector<16x16xf32>
    %49 = tpu.matmul %44, %48, %cst_18 {dimension_numbers = #tpu.dot_dimension_numbers<[1], [0], [0], [1], [0, 0, 1, 1], [], []>} : vector<16x16xbf16>, vector<16x16xbf16>, vector<16x16xf32> -> vector<16x16xf32>
    %50 = arith.addf %33, %49 : vector<16x16xf32>
    %c1_i32_19 = arith.constant 1 : i32
    %51 = arith.addi %10, %c1_i32_19 : i32
    %52 = arith.index_cast %51 : i32 to index
    %c0_20 = arith.constant 0 : index
    %c0_21 = arith.constant 0 : index
    %53 = vector.load %arg9[%52, %c0_20, %c0_21] : memref<15x16x16xbf16, #tpu.memory_space<vmem>>, vector<1x16x16xbf16>
    %54 = vector.shape_cast %53 : vector<1x16x16xbf16> to vector<16x16xbf16>
    %cst_22 = arith.constant dense<0.000000e+00> : vector<16x16xf32>
    %55 = tpu.matmul %44, %54, %cst_22 {dimension_numbers = #tpu.dot_dimension_numbers<[1], [0], [0], [1], [0, 0, 1, 1], [], []>} : vector<16x16xbf16>, vector<16x16xbf16>, vector<16x16xf32> -> vector<16x16xf32>
    %56 = arith.addf %39, %55 : vector<16x16xf32>
    %57 = arith.index_cast %arg1 : i32 to index
    %c2 = arith.constant 2 : index
    %58 = memref.load %arg2[%57, %c2] : memref<3x5xi32, #tpu.memory_space<smem>>
    %59 = arith.index_cast %58 : i32 to index
    %c0_23 = arith.constant 0 : index
    %60 = vector.load %arg21[%59, %c0_23] : memref<32x16xf32, #tpu.memory_space<vmem>>, vector<16x16xf32>
    %61 = arith.truncf %60 : vector<16x16xf32> to vector<16x16xbf16>
    %c2_i32 = arith.constant 2 : i32
    %62 = arith.addi %10, %c2_i32 : i32
    %63 = arith.index_cast %62 : i32 to index
    %c0_24 = arith.constant 0 : index
    %c0_25 = arith.constant 0 : index
    %64 = vector.load %arg8[%63, %c0_24, %c0_25] : memref<15x16x16xbf16, #tpu.memory_space<vmem>>, vector<1x16x16xbf16>
    %65 = vector.shape_cast %64 : vector<1x16x16xbf16> to vector<16x16xbf16>
    %cst_26 = arith.constant dense<0.000000e+00> : vector<16x16xf32>
    %66 = tpu.matmul %61, %65, %cst_26 {dimension_numbers = #tpu.dot_dimension_numbers<[1], [0], [0], [1], [0, 0, 1, 1], [], []>} : vector<16x16xbf16>, vector<16x16xbf16>, vector<16x16xf32> -> vector<16x16xf32>
    %67 = arith.addf %50, %66 : vector<16x16xf32>
    %c2_i32_27 = arith.constant 2 : i32
    %68 = arith.addi %10, %c2_i32_27 : i32
    %69 = arith.index_cast %68 : i32 to index
    %c0_28 = arith.constant 0 : index
    %c0_29 = arith.constant 0 : index
    %70 = vector.load %arg9[%69, %c0_28, %c0_29] : memref<15x16x16xbf16, #tpu.memory_space<vmem>>, vector<1x16x16xbf16>
    %71 = vector.shape_cast %70 : vector<1x16x16xbf16> to vector<16x16xbf16>
    %cst_30 = arith.constant dense<0.000000e+00> : vector<16x16xf32>
    %72 = tpu.matmul %61, %71, %cst_30 {dimension_numbers = #tpu.dot_dimension_numbers<[1], [0], [0], [1], [0, 0, 1, 1], [], []>} : vector<16x16xbf16>, vector<16x16xbf16>, vector<16x16xf32> -> vector<16x16xf32>
    %73 = arith.addf %56, %72 : vector<16x16xf32>
    %74 = arith.index_cast %arg1 : i32 to index
    %c3 = arith.constant 3 : index
    %75 = memref.load %arg2[%74, %c3] : memref<3x5xi32, #tpu.memory_space<smem>>
    %76 = arith.index_cast %75 : i32 to index
    %c0_31 = arith.constant 0 : index
    %77 = vector.load %arg21[%76, %c0_31] : memref<32x16xf32, #tpu.memory_space<vmem>>, vector<16x16xf32>
    %78 = arith.truncf %77 : vector<16x16xf32> to vector<16x16xbf16>
    %c3_i32 = arith.constant 3 : i32
    %79 = arith.addi %10, %c3_i32 : i32
    %80 = arith.index_cast %79 : i32 to index
    %c0_32 = arith.constant 0 : index
    %c0_33 = arith.constant 0 : index
    %81 = vector.load %arg8[%80, %c0_32, %c0_33] : memref<15x16x16xbf16, #tpu.memory_space<vmem>>, vector<1x16x16xbf16>
    %82 = vector.shape_cast %81 : vector<1x16x16xbf16> to vector<16x16xbf16>
    %cst_34 = arith.constant dense<0.000000e+00> : vector<16x16xf32>
    %83 = tpu.matmul %78, %82, %cst_34 {dimension_numbers = #tpu.dot_dimension_numbers<[1], [0], [0], [1], [0, 0, 1, 1], [], []>} : vector<16x16xbf16>, vector<16x16xbf16>, vector<16x16xf32> -> vector<16x16xf32>
    %84 = arith.addf %67, %83 : vector<16x16xf32>
    %c3_i32_35 = arith.constant 3 : i32
    %85 = arith.addi %10, %c3_i32_35 : i32
    %86 = arith.index_cast %85 : i32 to index
    %c0_36 = arith.constant 0 : index
    %c0_37 = arith.constant 0 : index
    %87 = vector.load %arg9[%86, %c0_36, %c0_37] : memref<15x16x16xbf16, #tpu.memory_space<vmem>>, vector<1x16x16xbf16>
    %88 = vector.shape_cast %87 : vector<1x16x16xbf16> to vector<16x16xbf16>
    %cst_38 = arith.constant dense<0.000000e+00> : vector<16x16xf32>
    %89 = tpu.matmul %78, %88, %cst_38 {dimension_numbers = #tpu.dot_dimension_numbers<[1], [0], [0], [1], [0, 0, 1, 1], [], []>} : vector<16x16xbf16>, vector<16x16xbf16>, vector<16x16xf32> -> vector<16x16xf32>
    %90 = arith.addf %73, %89 : vector<16x16xf32>
    %91 = arith.index_cast %arg1 : i32 to index
    %c4 = arith.constant 4 : index
    %92 = memref.load %arg2[%91, %c4] : memref<3x5xi32, #tpu.memory_space<smem>>
    %93 = arith.index_cast %92 : i32 to index
    %c0_39 = arith.constant 0 : index
    %94 = vector.load %arg21[%93, %c0_39] : memref<32x16xf32, #tpu.memory_space<vmem>>, vector<16x16xf32>
    %95 = arith.truncf %94 : vector<16x16xf32> to vector<16x16xbf16>
    %c4_i32 = arith.constant 4 : i32
    %96 = arith.addi %10, %c4_i32 : i32
    %97 = arith.index_cast %96 : i32 to index
    %c0_40 = arith.constant 0 : index
    %c0_41 = arith.constant 0 : index
    %98 = vector.load %arg8[%97, %c0_40, %c0_41] : memref<15x16x16xbf16, #tpu.memory_space<vmem>>, vector<1x16x16xbf16>
    %99 = vector.shape_cast %98 : vector<1x16x16xbf16> to vector<16x16xbf16>
    %cst_42 = arith.constant dense<0.000000e+00> : vector<16x16xf32>
    %100 = tpu.matmul %95, %99, %cst_42 {dimension_numbers = #tpu.dot_dimension_numbers<[1], [0], [0], [1], [0, 0, 1, 1], [], []>} : vector<16x16xbf16>, vector<16x16xbf16>, vector<16x16xf32> -> vector<16x16xf32>
    %101 = arith.addf %84, %100 : vector<16x16xf32>
    %c4_i32_43 = arith.constant 4 : i32
    %102 = arith.addi %10, %c4_i32_43 : i32
    %103 = arith.index_cast %102 : i32 to index
    %c0_44 = arith.constant 0 : index
    %c0_45 = arith.constant 0 : index
    %104 = vector.load %arg9[%103, %c0_44, %c0_45] : memref<15x16x16xbf16, #tpu.memory_space<vmem>>, vector<1x16x16xbf16>
    %105 = vector.shape_cast %104 : vector<1x16x16xbf16> to vector<16x16xbf16>
    %cst_46 = arith.constant dense<0.000000e+00> : vector<16x16xf32>
    %106 = tpu.matmul %95, %105, %cst_46 {dimension_numbers = #tpu.dot_dimension_numbers<[1], [0], [0], [1], [0, 0, 1, 1], [], []>} : vector<16x16xbf16>, vector<16x16xbf16>, vector<16x16xf32> -> vector<16x16xf32>
    %107 = arith.addf %90, %106 : vector<16x16xf32>
    %108 = math.tanh %101 : vector<16x16xf32>
    %109 = arith.negf %107 : vector<16x16xf32>
    %110 = math.exp %109 : vector<16x16xf32>
    %cst_47 = arith.constant 1.000000e+00 : f32
    %111 = vector.broadcast %cst_47 : f32 to vector<16x16xf32>
    %112 = arith.addf %111, %110 : vector<16x16xf32>
    %113 = arith.divf %111, %112 : vector<16x16xf32>
    %114 = arith.mulf %108, %113 : vector<16x16xf32>
    %115 = arith.truncf %114 : vector<16x16xf32> to vector<16x16xbf16>
    %116 = arith.index_cast %arg1 : i32 to index
    %c0_48 = arith.constant 0 : index
    %c0_49 = arith.constant 0 : index
    %117 = vector.load %arg12[%116, %c0_48, %c0_49] : memref<3x16x16xbf16, #tpu.memory_space<vmem>>, vector<1x16x16xbf16>
    %118 = vector.shape_cast %117 : vector<1x16x16xbf16> to vector<16x16xbf16>
    %cst_50 = arith.constant dense<0.000000e+00> : vector<16x16xf32>
    %119 = tpu.matmul %115, %118, %cst_50 {dimension_numbers = #tpu.dot_dimension_numbers<[1], [0], [0], [1], [0, 0, 1, 1], [], []>} : vector<16x16xbf16>, vector<16x16xbf16>, vector<16x16xf32> -> vector<16x16xf32>
    %120 = arith.index_cast %arg1 : i32 to index
    %c0_51 = arith.constant 0 : index
    %c0_52 = arith.constant 0 : index
    %121 = vector.load %arg13[%120, %c0_51, %c0_52] : memref<3x1x16xf32, #tpu.memory_space<vmem>>, vector<1x1x16xf32>
    %122 = vector.shape_cast %121 : vector<1x1x16xf32> to vector<1x16xf32>
    %123 = vector.broadcast %122 : vector<1x16xf32> to vector<16x16xf32>
    %124 = arith.addf %119, %123 : vector<16x16xf32>
    %125 = arith.index_cast %arg1 : i32 to index
    %c0_53 = arith.constant 0 : index
    %c0_54 = arith.constant 0 : index
    %126 = vector.load %arg14[%125, %c0_53, %c0_54] : memref<3x16x16xbf16, #tpu.memory_space<vmem>>, vector<1x16x16xbf16>
    %127 = vector.shape_cast %126 : vector<1x16x16xbf16> to vector<16x16xbf16>
    %cst_55 = arith.constant dense<0.000000e+00> : vector<16x16xf32>
    %128 = tpu.matmul %115, %127, %cst_55 {dimension_numbers = #tpu.dot_dimension_numbers<[1], [0], [0], [1], [0, 0, 1, 1], [], []>} : vector<16x16xbf16>, vector<16x16xbf16>, vector<16x16xf32> -> vector<16x16xf32>
    %129 = arith.index_cast %arg1 : i32 to index
    %c0_56 = arith.constant 0 : index
    %c0_57 = arith.constant 0 : index
    %130 = vector.load %arg15[%129, %c0_56, %c0_57] : memref<3x1x16xf32, #tpu.memory_space<vmem>>, vector<1x1x16xf32>
    %131 = vector.shape_cast %130 : vector<1x1x16xf32> to vector<1x16xf32>
    %132 = vector.broadcast %131 : vector<1x16xf32> to vector<16x16xf32>
    %133 = arith.addf %128, %132 : vector<16x16xf32>
    %c8 = arith.constant 8 : index
    %c0_58 = arith.constant 0 : index
    %134 = vector.load %arg21[%c8, %c0_58] : memref<32x16xf32, #tpu.memory_space<vmem>>, vector<16x16xf32>
    %135 = arith.addf %134, %124 : vector<16x16xf32>
    %136 = vector.broadcast %6 : vector<16x1xf32> to vector<16x16xf32>
    %137 = arith.mulf %135, %136 : vector<16x16xf32>
    %c8_59 = arith.constant 8 : index
    %c0_60 = arith.constant 0 : index
    %138 = vector.load %arg21[%c8_59, %c0_60] : memref<32x16xf32, #tpu.memory_space<vmem>>, vector<16x16xf32>
    tpu.vector_store %arg21[%c8_59, %c0_60], %137 {strides = array<i32>} : memref<32x16xf32, #tpu.memory_space<vmem>>, vector<16x16xf32>,
    %c0_61 = arith.constant 0 : index
    %c0_62 = arith.constant 0 : index
    %139 = vector.load %arg22[%c0_61, %c0_62] : memref<16x16xf32, #tpu.memory_space<vmem>>, vector<16x16xf32>
    %140 = arith.addf %139, %133 : vector<16x16xf32>
    %c0_63 = arith.constant 0 : index
    %c0_64 = arith.constant 0 : index
    %141 = vector.load %arg22[%c0_63, %c0_64] : memref<16x16xf32, #tpu.memory_space<vmem>>, vector<16x16xf32>
    tpu.vector_store %arg22[%c0_63, %c0_64], %140 {strides = array<i32>} : memref<16x16xf32, #tpu.memory_space<vmem>>, vector<16x16xf32>,
    %c2_i32_65 = arith.constant 2 : i32
    %142 = arith.cmpi eq, %arg1, %c2_i32_65 : i32
    %143 = arith.extui %142 : i1 to i32
    %c0_i32_66 = arith.constant 0 : i32
    %144 = arith.cmpi ne, %143, %c0_i32_66 : i32
    scf.if %144 {
      %c0_67 = arith.constant 0 : index
      %c0_68 = arith.constant 0 : index
      %145 = vector.load %arg22[%c0_67, %c0_68] : memref<16x16xf32, #tpu.memory_space<vmem>>, vector<16x16xf32>
      %146 = vector.broadcast %6 : vector<16x1xf32> to vector<16x16xf32>
      %147 = arith.mulf %145, %146 : vector<16x16xf32>
      %148 = arith.truncf %147 : vector<16x16xf32> to vector<16x16xbf16>
      %c0_69 = arith.constant 0 : index
      %c0_70 = arith.constant 0 : index
      %149 = vector.load %arg16[%c0_69, %c0_70] : memref<16x4xbf16, #tpu.memory_space<vmem>>, vector<16x4xbf16>
      %cst_71 = arith.constant dense<0.000000e+00> : vector<16x4xf32>
      %150 = tpu.matmul %148, %149, %cst_71 {dimension_numbers = #tpu.dot_dimension_numbers<[1], [0], [0], [1], [0, 0, 1, 1], [], []>} : vector<16x16xbf16>, vector<16x4xbf16>, vector<16x4xf32> -> vector<16x4xf32>
      %c0_72 = arith.constant 0 : index
      %c0_73 = arith.constant 0 : index
      %151 = vector.load %arg17[%c0_72, %c0_73] : memref<1x4xf32, #tpu.memory_space<vmem>>, vector<1x4xf32>
      %152 = vector.broadcast %151 : vector<1x4xf32> to vector<16x4xf32>
      %153 = arith.addf %150, %152 : vector<16x4xf32>
      %154 = vector.broadcast %6 : vector<16x1xf32> to vector<16x4xf32>
      %155 = arith.mulf %153, %154 : vector<16x4xf32>
      %c0_74 = arith.constant 0 : index
      %c0_75 = arith.constant 0 : index
      %156 = vector.load %arg18[%c0_74, %c0_75] : memref<16x4xbf16, #tpu.memory_space<vmem>>, vector<16x4xbf16>
      %cst_76 = arith.constant dense<0.000000e+00> : vector<16x4xf32>
      %157 = tpu.matmul %148, %156, %cst_76 {dimension_numbers = #tpu.dot_dimension_numbers<[1], [0], [0], [1], [0, 0, 1, 1], [], []>} : vector<16x16xbf16>, vector<16x4xbf16>, vector<16x4xf32> -> vector<16x4xf32>
      %c0_77 = arith.constant 0 : index
      %c0_78 = arith.constant 0 : index
      %158 = vector.load %arg19[%c0_77, %c0_78] : memref<1x4xf32, #tpu.memory_space<vmem>>, vector<1x4xf32>
      %159 = vector.broadcast %158 : vector<1x4xf32> to vector<16x4xf32>
      %160 = arith.addf %157, %159 : vector<16x4xf32>
      %161 = vector.broadcast %6 : vector<16x1xf32> to vector<16x4xf32>
      %162 = arith.mulf %160, %161 : vector<16x4xf32>
      %c0_79 = arith.constant 0 : index
      %c0_80 = arith.constant 0 : index
      %c0_81 = arith.constant 0 : index
      %163 = vector.load %arg5[%c0_79, %c0_80, %c0_81] : memref<1x16x4xf32, #tpu.memory_space<vmem>>, vector<1x16x4xf32>
      %164 = vector.shape_cast %163 : vector<1x16x4xf32> to vector<16x4xf32>
      %165 = math.exp %162 : vector<16x4xf32>
      %166 = arith.mulf %164, %165 : vector<16x4xf32>
      %167 = arith.addf %155, %166 : vector<16x4xf32>
      %168 = vector.broadcast %6 : vector<16x1xf32> to vector<16x4xf32>
      %169 = arith.mulf %167, %168 : vector<16x4xf32>
      %c0_82 = arith.constant 0 : index
      %c0_83 = arith.constant 0 : index
      %c0_84 = arith.constant 0 : index
      %170 = vector.load %arg20[%c0_82, %c0_83, %c0_84] : memref<1x16x128xf32, #tpu.memory_space<vmem>>, vector<1x16x4xf32>
      %171 = vector.shape_cast %170 : vector<1x16x4xf32> to vector<16x4xf32>
      %172 = vector.shape_cast %169 : vector<16x4xf32> to vector<1x16x4xf32>
      tpu.vector_store %arg20[%c0_82, %c0_83, %c0_84], %172 {strides = array<i32>} : memref<1x16x128xf32, #tpu.memory_space<vmem>>, vector<1x16x4xf32>,
      %c0_85 = arith.constant 0 : index
      %c0_86 = arith.constant 0 : index
      %c4_87 = arith.constant 4 : index
      %173 = vector.load %arg20[%c0_85, %c0_86, %c4_87] : memref<1x16x128xf32, #tpu.memory_space<vmem>>, vector<1x16x4xf32>
      %174 = vector.shape_cast %173 : vector<1x16x4xf32> to vector<16x4xf32>
      %175 = vector.shape_cast %155 : vector<16x4xf32> to vector<1x16x4xf32>
      tpu.vector_store %arg20[%c0_85, %c0_86, %c4_87], %175 {strides = array<i32>} : memref<1x16x128xf32, #tpu.memory_space<vmem>>, vector<1x16x4xf32>,
      %c0_88 = arith.constant 0 : index
      %c0_89 = arith.constant 0 : index
      %c8_90 = arith.constant 8 : index
      %176 = vector.load %arg20[%c0_88, %c0_89, %c8_90] : memref<1x16x128xf32, #tpu.memory_space<vmem>>, vector<1x16x4xf32>
      %177 = vector.shape_cast %176 : vector<1x16x4xf32> to vector<16x4xf32>
      %178 = vector.shape_cast %162 : vector<16x4xf32> to vector<1x16x4xf32>
      tpu.vector_store %arg20[%c0_88, %c0_89, %c8_90], %178 {strides = array<i32>} : memref<1x16x128xf32, #tpu.memory_space<vmem>>, vector<1x16x4xf32>,
    } else {
    }
    return
  }
  func.func @transform_0(%arg0: i32, %arg1: i32, %arg2: memref<3x5xi32, #tpu.memory_space<smem>>, %arg3: memref<2xi32, #tpu.memory_space<smem>>) -> (i32, i32, i32) {
    %c0_i32 = arith.constant 0 : i32
    %c0_i32_0 = arith.constant 0 : i32
    %c0_i32_1 = arith.constant 0 : i32
    return %arg0, %c0_i32, %c0_i32_0 : i32, i32, i32
  }
  func.func @transform_1(%arg0: i32, %arg1: i32, %arg2: memref<3x5xi32, #tpu.memory_space<smem>>, %arg3: memref<2xi32, #tpu.memory_space<smem>>) -> (i32, i32, i32) {
    %c0_i32 = arith.constant 0 : i32
    %c0_i32_0 = arith.constant 0 : i32
    %c0_i32_1 = arith.constant 0 : i32
    return %arg0, %c0_i32, %c0_i32_0 : i32, i32, i32
  }
  func.func @transform_2(%arg0: i32, %arg1: i32, %arg2: memref<3x5xi32, #tpu.memory_space<smem>>, %arg3: memref<2xi32, #tpu.memory_space<smem>>) -> (i32, i32) {
    %c0_i32 = arith.constant 0 : i32
    %c0_i32_0 = arith.constant 0 : i32
    %c0_i32_1 = arith.constant 0 : i32
    return %c0_i32, %c0_i32_0 : i32, i32
  }
  func.func @transform_3(%arg0: i32, %arg1: i32, %arg2: memref<3x5xi32, #tpu.memory_space<smem>>, %arg3: memref<2xi32, #tpu.memory_space<smem>>) -> (i32, i32) {
    %c0_i32 = arith.constant 0 : i32
    %c0_i32_0 = arith.constant 0 : i32
    %c0_i32_1 = arith.constant 0 : i32
    return %c0_i32, %c0_i32_0 : i32, i32
  }
  func.func @transform_4(%arg0: i32, %arg1: i32, %arg2: memref<3x5xi32, #tpu.memory_space<smem>>, %arg3: memref<2xi32, #tpu.memory_space<smem>>) -> (i32, i32, i32) {
    %c0_i32 = arith.constant 0 : i32
    %c0_i32_0 = arith.constant 0 : i32
    %c0_i32_1 = arith.constant 0 : i32
    %c0_i32_2 = arith.constant 0 : i32
    return %c0_i32, %c0_i32_0, %c0_i32_1 : i32, i32, i32
  }
  func.func @transform_5(%arg0: i32, %arg1: i32, %arg2: memref<3x5xi32, #tpu.memory_space<smem>>, %arg3: memref<2xi32, #tpu.memory_space<smem>>) -> (i32, i32, i32) {
    %c0_i32 = arith.constant 0 : i32
    %c0_i32_0 = arith.constant 0 : i32
    %c0_i32_1 = arith.constant 0 : i32
    %c0_i32_2 = arith.constant 0 : i32
    return %c0_i32, %c0_i32_0, %c0_i32_1 : i32, i32, i32
  }
  func.func @transform_6(%arg0: i32, %arg1: i32, %arg2: memref<3x5xi32, #tpu.memory_space<smem>>, %arg3: memref<2xi32, #tpu.memory_space<smem>>) -> (i32, i32, i32) {
    %c0_i32 = arith.constant 0 : i32
    %c0_i32_0 = arith.constant 0 : i32
    %c0_i32_1 = arith.constant 0 : i32
    %c0_i32_2 = arith.constant 0 : i32
    return %c0_i32, %c0_i32_0, %c0_i32_1 : i32, i32, i32
  }
  func.func @transform_7(%arg0: i32, %arg1: i32, %arg2: memref<3x5xi32, #tpu.memory_space<smem>>, %arg3: memref<2xi32, #tpu.memory_space<smem>>) -> (i32, i32, i32) {
    %c0_i32 = arith.constant 0 : i32
    %c0_i32_0 = arith.constant 0 : i32
    %c0_i32_1 = arith.constant 0 : i32
    %c0_i32_2 = arith.constant 0 : i32
    return %c0_i32, %c0_i32_0, %c0_i32_1 : i32, i32, i32
  }
  func.func @transform_8(%arg0: i32, %arg1: i32, %arg2: memref<3x5xi32, #tpu.memory_space<smem>>, %arg3: memref<2xi32, #tpu.memory_space<smem>>) -> (i32, i32, i32) {
    %c0_i32 = arith.constant 0 : i32
    %c0_i32_0 = arith.constant 0 : i32
    %c0_i32_1 = arith.constant 0 : i32
    %c0_i32_2 = arith.constant 0 : i32
    return %c0_i32, %c0_i32_0, %c0_i32_1 : i32, i32, i32
  }
  func.func @transform_9(%arg0: i32, %arg1: i32, %arg2: memref<3x5xi32, #tpu.memory_space<smem>>, %arg3: memref<2xi32, #tpu.memory_space<smem>>) -> (i32, i32, i32) {
    %c0_i32 = arith.constant 0 : i32
    %c0_i32_0 = arith.constant 0 : i32
    %c0_i32_1 = arith.constant 0 : i32
    %c0_i32_2 = arith.constant 0 : i32
    return %c0_i32, %c0_i32_0, %c0_i32_1 : i32, i32, i32
  }
  func.func @transform_10(%arg0: i32, %arg1: i32, %arg2: memref<3x5xi32, #tpu.memory_space<smem>>, %arg3: memref<2xi32, #tpu.memory_space<smem>>) -> (i32, i32, i32) {
    %c0_i32 = arith.constant 0 : i32
    %c0_i32_0 = arith.constant 0 : i32
    %c0_i32_1 = arith.constant 0 : i32
    %c0_i32_2 = arith.constant 0 : i32
    return %c0_i32, %c0_i32_0, %c0_i32_1 : i32, i32, i32
  }
  func.func @transform_11(%arg0: i32, %arg1: i32, %arg2: memref<3x5xi32, #tpu.memory_space<smem>>, %arg3: memref<2xi32, #tpu.memory_space<smem>>) -> (i32, i32, i32) {
    %c0_i32 = arith.constant 0 : i32
    %c0_i32_0 = arith.constant 0 : i32
    %c0_i32_1 = arith.constant 0 : i32
    %c0_i32_2 = arith.constant 0 : i32
    return %c0_i32, %c0_i32_0, %c0_i32_1 : i32, i32, i32
  }
  func.func @transform_12(%arg0: i32, %arg1: i32, %arg2: memref<3x5xi32, #tpu.memory_space<smem>>, %arg3: memref<2xi32, #tpu.memory_space<smem>>) -> (i32, i32) {
    %c0_i32 = arith.constant 0 : i32
    %c0_i32_0 = arith.constant 0 : i32
    %c0_i32_1 = arith.constant 0 : i32
    return %c0_i32, %c0_i32_0 : i32, i32
  }
  func.func @transform_13(%arg0: i32, %arg1: i32, %arg2: memref<3x5xi32, #tpu.memory_space<smem>>, %arg3: memref<2xi32, #tpu.memory_space<smem>>) -> (i32, i32) {
    %c0_i32 = arith.constant 0 : i32
    %c0_i32_0 = arith.constant 0 : i32
    %c0_i32_1 = arith.constant 0 : i32
    return %c0_i32, %c0_i32_0 : i32, i32
  }
  func.func @transform_14(%arg0: i32, %arg1: i32, %arg2: memref<3x5xi32, #tpu.memory_space<smem>>, %arg3: memref<2xi32, #tpu.memory_space<smem>>) -> (i32, i32) {
    %c0_i32 = arith.constant 0 : i32
    %c0_i32_0 = arith.constant 0 : i32
    %c0_i32_1 = arith.constant 0 : i32
    return %c0_i32, %c0_i32_0 : i32, i32
  }
  func.func @transform_15(%arg0: i32, %arg1: i32, %arg2: memref<3x5xi32, #tpu.memory_space<smem>>, %arg3: memref<2xi32, #tpu.memory_space<smem>>) -> (i32, i32) {
    %c0_i32 = arith.constant 0 : i32
    %c0_i32_0 = arith.constant 0 : i32
    %c0_i32_1 = arith.constant 0 : i32
    return %c0_i32, %c0_i32_0 : i32, i32
  }
  func.func @transform_16(%arg0: i32, %arg1: i32, %arg2: memref<3x5xi32, #tpu.memory_space<smem>>, %arg3: memref<2xi32, #tpu.memory_space<smem>>) -> (i32, i32, i32) {
    %c0_i32 = arith.constant 0 : i32
    %c0_i32_0 = arith.constant 0 : i32
    %c0_i32_1 = arith.constant 0 : i32
    return %arg0, %c0_i32, %c0_i32_0 : i32, i32, i32
  }
}

</mosaic_0001>

<bundles_post_ra>
// kernel: tpu_custom_call.1
= control target key start
LH: loop header
LB: loop body
LE: loop exit
PB: predicated region body
PF: predicated region fallthrough
CT: control target
= control target key end

     0   :  { %s1918_s20 = smov [#allocation6]   ;;  %s2308_s0 = inlined_call_operand.vmem [shape: s32[3,5], index: 0, kind: input, shape index: {}]   ;;  %s2309_s2 = inlined_call_operand.vmem [shape: bf16[2,16,8], index: 2, kind: input, shape index: {}]   ;;  %s2310_s3 = inlined_call_operand.vmem [shape: f32[2,16,4], index: 3, kind: input, shape index: {}]   ;;  %s2311_s4 = inlined_call_operand.vmem [shape: bf16[8,16], index: 4, kind: input, shape index: {}]   ;;  %s2312_s5 = inlined_call_operand.hbm [shape: f32[1,16], index: 5, kind: input, shape index: {}]   ;;  %s2313_s6 = inlined_call_operand.hbm [shape: bf16[15,16,16], index: 6, kind: input, shape index: {}]   ;;  %s2314_s7 = inlined_call_operand.hbm [shape: bf16[15,16,16], index: 7, kind: input, shape index: {}]   ;;  %s2315_s8 = inlined_call_operand.vmem [shape: f32[3,1,16], index: 8, kind: input, shape index: {}]   ;;  %s2316_s9 = inlined_call_operand.vmem [shape: f32[3,1,16], index: 9, kind: input, shape index: {}]   ;;  %s2317_s10 = inlined_call_operand.vmem [shape: bf16[3,16,16], index: 10, kind: input, shape index: {}]   ;;  %s2318_s11 = inlined_call_operand.vmem [shape: f32[3,1,16], index: 11, kind: input, shape index: {}]   ;;  %s2319_s12 = inlined_call_operand.vmem [shape: bf16[3,16,16], index: 12, kind: input, shape index: {}]   ;;  %s2320_s13 = inlined_call_operand.vmem [shape: f32[3,1,16], index: 13, kind: input, shape index: {}]   ;;  %s2321_s14 = inlined_call_operand.vmem [shape: bf16[16,4], index: 14, kind: input, shape index: {}]   ;;  %s2322_s15 = inlined_call_operand.vmem [shape: f32[1,4], index: 15, kind: input, shape index: {}]   ;;  %s2323_s16 = inlined_call_operand.vmem [shape: bf16[16,4], index: 16, kind: input, shape index: {}]   ;;  %s2324_s17 = inlined_call_operand.vmem [shape: f32[1,4], index: 17, kind: input, shape index: {}]   ;;  %s2325_s18 = inlined_call_operand.hbm [shape: f32[2,16,128], index: 18, kind: output, shape index: {}]   ;;  %s2326_s1 = inlined_call_operand.hbm [shape: s32[2], index: 1, kind: input, shape index: {}]  }
   0x1   :  { %2339 = sst [smem:[#allocation28_spill]] %s2308_s0  ;;  %s29_s19 = sshll.u32 %s2326_s1, 4  ;;  %s30_s19 = int_to_ptr.hbm [resolvable:$true] %s29_s19 }
   0x2   :  { %2340 = sst [smem:[#allocation29_spill]] %s2309_s2  ;;  %s1917_s2 = smov [#allocation5]  }
   0x3   :  { %2341 = sst [smem:[#allocation30_spill]] %s2310_s3 }
   0x4   :  { %2342 = sst [smem:[#allocation31_spill]] %s2311_s4 }
   0x5   :  { %2343 = sst [smem:[#allocation32_spill]] %s2313_s6 }
   0x6   :  { %2344 = sst [smem:[#allocation33_spill]] %s2320_s13 }
   0x7   :  { %2345 = sst [smem:[#allocation34_spill]] %s2324_s17 }
   0x8   :  { %2346 = sst [smem:[#allocation35_spill]] %s2325_s18 }
   0x9   :  { %s2347_s29 = sld [smem:[#allocation28_spill]] }
   0xf   :  { %s24_s13 = sshll.u32 %s2347_s29, 4  ;;  %s25_s13 = int_to_ptr.vmem [resolvable:$true] %s24_s13 }
  0x10   :  { %27 = dma.vmem_to_smem %s25_s13, 64, %s1917_s2, [#allocation4] }
  0x11   :  { %32 = dma.hbm_to_smem %s30_s19, 16, %s1918_s20, [#allocation4] }
  0x12   :  { %1871 = dma.done.wait [#allocation4], 80 }
  0x13   :  { %1872 = vsyncadd [#allocation4], 4294967216 }
  0x14   :  { %35 = sfence }
  0x15   :  { %36 = vsyncpa [#allocation8], 0 }
  0x16   :  { %37 = vsyncpa [#allocation11], 0 }
  0x17   :  { %38 = vsyncpa [#allocation9], 0 }
  0x18   :  { %40 = vsyncpa [#allocation9 + $0x1], 0  ;;  %s2031_s21 = smov 0   ;;  %s2033_s22 = smov 0  }
  0x19   :  { %s2035_s3 = smov 0   ;;  %s2037_s1 = smov 0  }
  0x1a   :  { %s2039_s23 = smov 0   ;;  %s2041_s13 = smov 0  }
  0x1b   :  { %s2043_s24 = smov 0   ;;  %s2045_s25 = smov 0  }
  0x1c LB: > { %2348 = sst [smem:[#allocation18_spill]] %s1887_s21  ;;  %s1407_s26 = sadd.s32 4294967295, %s1915_s25   ;;  %s1915_s25 = sphi %s2045_s25, %s46_s25   ;;  %s1911_s24 = sphi %s2043_s24, %s2380_s24   ;;  %s1907_s13 = sphi %s2041_s13, %s2379_s13   ;;  %s1903_s23 = sphi %s2039_s23, %s2378_s23   ;;  %s1899_s1 = sphi %s2037_s1, %s2377_s1   ;;  %s1895_s3 = sphi %s2035_s3, %s2376_s3   ;;  %s1891_s22 = sphi %s2033_s22, %s2382_s22   ;;  %s1887_s21 = sphi %s2031_s21, %s2381_s21  }
  0x1d   : > { %2349 = sst [smem:[#allocation19_spill]] %s1895_s3  ;;  %s1408_s27 = sadd.s32 4294967294, %s1915_s25  }
  0x1e   : > { %2350 = sst [smem:[#allocation20_spill]] %s1907_s13  ;;  %s55_s28 = sadd.s32 1, %s1907_s13 }
  0x1f   : > { %2351 = sst [smem:[#allocation21_spill]] %s1911_s24  ;;  %s58_s29 = sadd.s32 1, %s1911_s24 }
  0x20   : > { %2352 = sst [smem:[#allocation22_spill]] %s1915_s25  ;;  %p56_p0 = scmp.ge.s32.totalorder %s55_s28, 3 }
  0x21   : > { %s411_s30 = sadd.s32 1, %s1895_s3  ;;  %p421_p1 = scmp.ne.s32.totalorder %s1895_s3, %s1891_s22 }
  0x22   : > { %p422_p2 = scmp.eq.s32.totalorder %s1407_s26, 5  ;;  %s2384_s28 = smov (%p56_p0, %s55_s28), 0 }
  0x23   : > { %2353 = sst [smem:[#allocation23_spill]] %s2384_s28  ;;  %s2386_s29 = smov (!%p56_p0, %s58_s29), %s1911_s24 }
  0x24   : > { %p2081_p3 = por %p422_p2, %p421_p1  ;;  %p427_p4 = scmp.ne.s32.totalorder %s1891_s22, %s1887_s21 }
  0x25   : > { %p60_p5 = scmp.ge.s32.totalorder %s2386_s29, 2  ;;  %p428_p6 = scmp.eq.s32.totalorder %s1408_s27, 5 }
  0x26   : > { %s2354_s0 = scalar_select %p2081_p3, 1, 0 }
  0x27   : > { %p1409_p7 = scmp.ge.s32.totalorder %s1915_s25, 1  ;;  %p435_p8 = scmp.lt.s32.totalorder %s1915_s25, 7 }
  0x28   : > { %2355 = sst [smem:[#allocation24_spill]] %s2354_s0  ;;  %s2388_s29 = smov (%p60_p5, %s2386_s29), 0 }
  0x29   : > { %2356 = sst [smem:[#allocation25_spill]] %s2388_s29  ;;  %p2091_p9 = por %p428_p6, %p427_p4 }
  0x2a   : > { %p2095_p10 = pnand %p1409_p7, %p435_p8  ;;  %s408_s20 = ssub.s32 %s1911_s24, %s2388_s29 }
  0x2b   : > { %s2357_s19 = scalar_select %p2091_p9, 1, 0 }
  0x2c   : > { %p409_p11 = scmp.eq.s32.totalorder %s408_s20, 0  ;;  %p1576_p12 = pneg %p2095_p10 }
  0x2d   : > { %2358 = sst [smem:[#allocation26_spill]] %s2357_s19  ;;  %p2103_p13 = scmp.eq.s32.totalorder %s1407_s26, 0 }
  0x2e   : > { %s2361_s6 = sld [smem:[#allocation32_spill]]  ;;  %s1919_s20 = smov [#allocation10]  }
  0x2f   : > { %s2111_s25 = scalar_select %p409_p11, %s1895_s3, %s411_s30  }
  0x30   : > { %p2115_p0 = pnand %p2103_p13, %p1576_p12  ;;  %s463_s26 = sshll.u32 %s1919_s20, 4  ;;  %s464_s26 = int_to_ptr.vmem [resolvable:$true] %s463_s26 }
  0x31   : > { %2362 = sst [smem:[#allocation27_spill]] %s2111_s25  ;;  %s1920_s29 = smov 64  }
  0x32   : > { %s1921_s24 = smov 4   ;;  %s450_s30 = sshll.u32 %s2312_s5, 4  ;;  %s451_s30 = int_to_ptr.hbm [resolvable:$true] %s450_s30 }
  0x33   : > { %s475_s0 = sshll.u32 %s2314_s7, 4  ;;  %s1923_s20 = smov [#allocation12]   ;;  %s476_s0 = int_to_ptr.hbm [resolvable:$true] %s475_s0 }
  0x34   : > { %s461_s21 = sshll.u32 %s2361_s6, 4  ;;  %s1922_s6 = smov [#allocation7]   ;;  %s462_s21 = int_to_ptr.hbm [resolvable:$true] %s461_s21 }
  0x35   : > { %1582 = dma.hbm_to_vmem [thread:$0]  (!%p2115_p0), %s462_s21, 1920, %s464_s26, [#allocation11], %s1920_s29, %s1920_s29, %s1921_s24  }
  0x36   : > { %s452_s25 = sshll.u32 %s1922_s6, 4  ;;  %s477_s17 = sshll.u32 %s1923_s20, 4  ;;  %s453_s25 = int_to_ptr.vmem [resolvable:$true] %s452_s25  ;;  %s478_s17 = int_to_ptr.vmem [resolvable:$true] %s477_s17 }
  0x37   : > { %1579 = dma.hbm_to_vmem [thread:$0]  (!%p2115_p0), %s451_s30, 16, %s453_s25, [#allocation8]  }
  0x38   : > { %1585 = dma.hbm_to_vmem [thread:$0]  (!%p2115_p0), %s476_s0, 1920, %s478_s17, [#allocation11], %s1920_s29, %s1920_s29, %s1921_s24  }
  0x39   : > { %539 = sbr.rel (%p2095_p10) target bundleno = 864 (0x360), region = 84 }
  0x3e   : > { %1874 = dma.done.wait (%p2103_p13), [#allocation8], 16  }
  0x3f   : > { %1876 = vsyncadd (%p2103_p13), [#allocation8], 4294967280 }
  0x40   : > { %1878 = dma.done.wait (%p2103_p13), [#allocation11], 3840  }
  0x41   : > { %1880 = vsyncadd (%p2103_p13), [#allocation11], 4294963456  ;;  %v616_v0 = vlaneseq  ;;  %s2338_s6 = sand.u32 1, %s1891_s22   ;;  %p605_p1 = scmp.lt.s32.totalorder %s1903_s23, 1  ;;  %v1924_v4 = vmov 0.0  }
  0x42   : > { %s619_s17 = sld [smem:[#allocation6 + %s1903_s23]]  ;;  %s1418_s18 = sshll.u32 %s2338_s6, 4 }
  0x43   : > { %v617_v1 = vshrl.u32 %v616_v0, 7  ;;  %s606_s21 = scalar_select %p605_p1, %s1903_s23, 1 }
  0x44   : > { %s2364_s0 = sld [smem:[#allocation29_spill]]  ;;  %s2159_s28 = scalar_lea.vmem [#allocation13], %s1418_s18 }
  0x45   : > { %v618_v2 = vadd.s32 8, %v617_v1  ;;  %s1540_s3 = sshll.u32 %s606_s21, 3  ;;  %s1541_s24 = sshll.u32 %s606_s21, 4 }
  0x46   : > { %s2365_s26 = sld [smem:[#allocation30_spill]]  ;;  %p1425_p2 = scmp.ne.s32.totalorder %s1899_s1, 0 }
  0x47   : > { %s2366_s4 = sld [smem:[#allocation31_spill]] (!%p1425_p2) }
  0x48   : > { %v620_v3 = vstv %s619_s17  ;;  %630 = sbr.rel (%p1425_p2) target bundleno = 221 (0xdd), region = 100 }
  0x49   : > { %vm621_vm0 = vcmp.lt.s32.totalorder %v617_v1, %v620_v3  ;;  %vm622_vm1 = vcmp.lt.s32.totalorder %v618_v2, %v620_v3 }
  0x4a   : > { %s609_s19 = scalar_lea.vmem %s2364_s0, %s1540_s3  ;;  %v2155_v5 = vsel %vm621_vm0, 1.0, %v1924_v4  ;;  %v2157_v6 = vsel %vm622_vm1, 1.0, %v1924_v4 }
  0x4c   : > { %s2153_s13 = scalar_lea.vmem %s2365_s26, %s1541_s24 }
  0x4d   : > { %v633_v7 = vld [vmem:[%s2366_s4] sm:$0xf]  ;;  %vm647_vm2 = vcmask 1043456   ;;  %vm643_vm3 = vcmask 64512   ;;  %vm667_vm4 = vcmask 130048   ;;  %v1925_v10 = vmov 0.0  }
  0x4e   : > { %v649_v8 = vsel %vm647_vm2, %v633_v7, 0  ;;  %v1542_v9 = vld [vmem:[%s609_s19] sm:$0xff]  ;;  %668 = vst.msk [vmem:[#allocation2] sm:$0xff] %vm667_vm4, %v1925_v10  ;;  %v1674_v11 = vld [vmem:[#allocation7] ss:$0 sm:$0xff] }
  0x4f   : > { %658 = vmatpush.bf16.msra.mxu0 %v649_v8  ;;  %669 = vst.msk [vmem:[#allocation2 + $0x18] sm:$0xff] %vm667_vm4, %v1925_v10 }
  0x50   : > { %672 = vst.msk [vmem:[#allocation3] sm:$0xff] %vm667_vm4, %v1925_v10 }
  0x51   : > { %673 = vst.msk [vmem:[#allocation3 + $0x8] sm:$0xff] %vm667_vm4, %v1925_v10 }
  0x52   : > { %1430 = vmatmul.msk.bf16.vlgmr.msra.gmra.mxu0 %vm643_vm3, %v1542_v9 }
  0xcf   : > { %v660_v12 = vpop.f32.mrf.mxu0 }
  0xd0   : > { %v661_v13 = vadd.f32 %v1674_v11, %v660_v12 }
  0xd2   : > { %v665_v14 = vmul.f32 %v2155_v5, %v661_v13 }
  0xd4   : > { %670 = vst.msk [vmem:[#allocation2 + $0x8] sm:$0xff] %vm667_vm4, %v665_v14 }
  0xd7   : > { %v662_v15 = vpop.f32.mrf.mxu0 }
  0xd8   : > { %v663_v16 = vadd.f32 %v1674_v11, %v662_v15 }
  0xda   : > { %v666_v17 = vmul.f32 %v2157_v6, %v663_v16 }
  0xdc   : > { %671 = vst.msk [vmem:[#allocation2 + $0x10] sm:$0xff] %vm667_vm4, %v666_v17 }
  0xdd PF: > { %s1543_s17 = smul.u32 40, %s1899_s1  ;;  %s2169_s18 = sshll.u32 %s1899_s1, 7  ;;  %vm704_vm5 = vcmask 130048  }
  0xde   : > { %s688_s21 = sld [smem:[#allocation5 + %s2169_s18]]  ;;  %s750_s3 = sadd.s32 1, %s2169_s18 }
  0xdf   : > { %s695_s24 = scalar_lea.vmem [#allocation10], %s1543_s17  ;;  %s725_s25 = scalar_lea.vmem [#allocation12], %s1543_s17 }
  0xe0   : > { %v1544_v18 = vld [vmem:[%s695_s24] sm:$0xff]  ;;  %v1547_v20 = vld [vmem:[%s695_s24 + $0x8] sm:$0xff]  ;;  %s751_s29 = sld [smem:[#allocation5 + %s750_s3]]  ;;  %v1550_v22 = vld [vmem:[%s725_s25 + $0x10] sm:$0xff]  ;;  %s813_s0 = sadd.s32 2, %s2169_s18 }
  0xe1   : > { %v1546_v19 = vld [vmem:[%s725_s25] sm:$0xff]  ;;  %v1548_v21 = vld [vmem:[%s725_s25 + $0x8] sm:$0xff]  ;;  %v1552_v23 = vld [vmem:[%s725_s25 + $0x18] sm:$0xff]  ;;  %715 = vmatpush.bf16.msra.mxu0 %v1544_v18  ;;  %778 = vmatpush.bf16.msra.mxu2 %v1547_v20  ;;  %s675_s27 = scalar_lea.vmem %s2315_s8, %s1899_s1  ;;  %s681_s20 = scalar_lea.vmem %s2316_s9, %s1899_s1 }
  0xe2   : > { %741 = vmatpush.bf16.msra.mxu1 %v1546_v19  ;;  %v1549_v24 = vld [vmem:[%s695_s24 + $0x10] sm:$0xff]  ;;  %v1551_v25 = vld [vmem:[%s695_s24 + $0x18] sm:$0xff]  ;;  %804 = vmatpush.bf16.msra.mxu3 %v1548_v21  ;;  %v1554_v26 = vld [vmem:[%s725_s25 + $0x20] sm:$0xff]  ;;  %s876_s3 = sadd.s32 3, %s2169_s18  ;;  %s814_s6 = sld [smem:[#allocation5 + %s813_s0]] }
  0xe3   : > { %v1553_v27 = vld [vmem:[%s695_s24 + $0x20] sm:$0xff]  ;;  %s877_s24 = sld [smem:[#allocation5 + %s876_s3]]  ;;  %s1050_s19 = scalar_lea.vmem %s2318_s11, %s1899_s1 }
  0xe4   : > { %s689_s17 = scalar_lea.vmem [#allocation2], %s688_s21  ;;  %v1676_v50 = vld [vmem:[%s681_s20] ss:$0 sm:$0xff]  ;;  %s1555_s30 = sshll.u32 %s1899_s1, 3 }
  0xe5   : > { %v690_v28 = vld [vmem:[%s689_s17] sm:$0xff]  ;;  %v691_v29 = vld [vmem:[%s689_s17 + $0x8] sm:$0xff]  ;;  %841 = vmatpush.bf16.msrb.mxu0 %v1549_v24  ;;  %904 = vmatpush.bf16.msrb.mxu2 %v1551_v25  ;;  %p1524_p4 = scmp.ne.s32.totalorder %s1899_s1, 2 }
  0xe6   : > { %867 = vmatpush.bf16.msrb.mxu1 %v1550_v22  ;;  %930 = vmatpush.bf16.msrb.mxu3 %v1552_v23  ;;  %v692_v30 = vpack.c.bf16 %v691_v29, %v690_v28  ;;  %s752_s4 = scalar_lea.vmem [#allocation2], %s751_s29  ;;  %v1675_v10 = vld [vmem:[%s675_s27] ss:$0 sm:$0xff]  ;;  %s1926_s20 = smov (!%p1524_p4), 8  }
  0xe7   : > { %v753_v31 = vld [vmem:[%s752_s4] sm:$0xff]  ;;  %v754_v32 = vld [vmem:[%s752_s4 + $0x8] sm:$0xff]  ;;  %s939_s4 = sadd.s32 4, %s2169_s18  ;;  %s2367_s18 = sld [smem:[#allocation33_spill]] }
  0xe8   : > { %1438 = vmatmul.msk.bf16.vlgmr.msra.gmra.mxu0 %vm704_vm5, %v692_v30  ;;  %1444 = vmatmul.msk.bf16.vlgmr.msra.gmra.mxu1 %vm704_vm5, %v692_v30  ;;  %v755_v33 = vpack.c.bf16 %v754_v32, %v753_v31  ;;  %s815_s21 = scalar_lea.vmem [#allocation2], %s814_s6  ;;  %s940_s29 = sld [smem:[#allocation5 + %s939_s4]] }
  0xe9   : > { %967 = vmatpush.bf16.msra.mxu0 %v1553_v27  ;;  %v816_v34 = vld [vmem:[%s815_s21] sm:$0xff]  ;;  %v817_v35 = vld [vmem:[%s815_s21 + $0x8] sm:$0xff]  ;;  %s878_s25 = scalar_lea.vmem [#allocation2], %s877_s24  ;;  %s1047_s24 = scalar_lea.vmem %s2317_s10, %s1555_s30 }
  0xea   : > { %993 = vmatpush.bf16.msra.mxu1 %v1554_v26  ;;  %1452 = vmatmul.msk.bf16.vlgmr.msra.gmra.mxu2 %vm704_vm5, %v755_v33  ;;  %v879_v36 = vld [vmem:[%s878_s25] sm:$0xff]  ;;  %v880_v37 = vld [vmem:[%s878_s25 + $0x8] sm:$0xff]  ;;  %v818_v38 = vpack.c.bf16 %v817_v35, %v816_v34  ;;  %s1079_s4 = scalar_lea.vmem %s2319_s12, %s1555_s30 }
  0xeb   : > { %1460 = vmatmul.msk.bf16.vlgmr.msra.gmra.mxu3 %vm704_vm5, %v755_v33  ;;  %v881_v39 = vpack.c.bf16 %v880_v37, %v879_v36  ;;  %v1556_v1 = vld [vmem:[%s1047_s24] sm:$0xff] }
  0xec   : > { %v1558_v2 = vld [vmem:[%s1079_s4] sm:$0xff]  ;;  %1071 = vmatpush.bf16.msra.mxu2 %v1556_v1  ;;  %s2368_s4 = sld [smem:[#allocation34_spill]] (!%p1524_p4) }
  0xed   : > { %1100 = vmatpush.bf16.msra.mxu3 %v1558_v2  ;;  %s1082_s0 = scalar_lea.vmem %s2367_s18, %s1899_s1 }
  0xee   : > { %s941_s6 = scalar_lea.vmem [#allocation2], %s940_s29  ;;  %s1927_s29 = smov (!%p1524_p4), 4  }
  0xef   : > { %v942_v40 = vld [vmem:[%s941_s6] sm:$0xff]  ;;  %v943_v41 = vld [vmem:[%s941_s6 + $0x8] sm:$0xff] }
  0xf0   : > { %v944_v42 = vpack.c.bf16 %v943_v41, %v942_v40 }
  0xf8   : > { %1468 = vmatmul.msk.bf16.vlgmr.msrb.gmra.mxu0 %vm704_vm5, %v818_v38  ;;  %1476 = vmatmul.msk.bf16.vlgmr.msrb.gmra.mxu1 %vm704_vm5, %v818_v38 }
  0xfa   : > { %1484 = vmatmul.msk.bf16.vlgmr.msrb.gmra.mxu2 %vm704_vm5, %v881_v39 }
  0xfb   : > { %1492 = vmatmul.msk.bf16.vlgmr.msrb.gmra.mxu3 %vm704_vm5, %v881_v39 }
 0x108   : > { %1500 = vmatmul.msk.bf16.vlgmr.msra.gmra.mxu0 %vm704_vm5, %v944_v42  ;;  %1508 = vmatmul.msk.bf16.vlgmr.msra.gmra.mxu1 %vm704_vm5, %v944_v42 }
 0x165   : > { %v743_v43 = vpop.f32.mrf.mxu1  ;;  %v717_v44 = vpop.f32.mrf.mxu0 }
 0x166   : > { %v748_v52 = vadd.f32 %v1676_v50, %v743_v43  ;;  %v722_v15 = vadd.f32 %v1675_v10, %v717_v44 }
 0x16d   : > { %v745_v46 = vpop.f32.mrf.mxu1  ;;  %v719_v49 = vpop.f32.mrf.mxu0 }
 0x16e   : > { %v806_v45 = vpop.f32.mrf.mxu3  ;;  %v780_v53 = vpop.f32.mrf.mxu2  ;;  %v749_v60 = vadd.f32 %v1676_v50, %v745_v46  ;;  %v723_v18 = vadd.f32 %v1675_v10, %v719_v49 }
 0x16f   : > { %v811_v55 = vadd.f32 %v806_v45, %v748_v52  ;;  %v785_v19 = vadd.f32 %v780_v53, %v722_v15 }
 0x175   : > { %v869_v48 = vpop.f32.mrf.mxu1  ;;  %v843_v56 = vpop.f32.mrf.mxu0 }
 0x176   : > { %v808_v47 = vpop.f32.mrf.mxu3  ;;  %v874_v57 = vadd.f32 %v869_v48, %v811_v55  ;;  %v782_v62 = vpop.f32.mrf.mxu2  ;;  %v848_v24 = vadd.f32 %v843_v56, %v785_v19  ;;  %v1677_v56 = vld [vmem:[%s1050_s19] ss:$0 sm:$0xff] }
 0x177   : > { %v812_v63 = vadd.f32 %v808_v47, %v749_v60  ;;  %v786_v22 = vadd.f32 %v782_v62, %v723_v18 }
 0x17d   : > { %v871_v51 = vpop.f32.mrf.mxu1  ;;  %v845_v4 = vpop.f32.mrf.mxu0 }
 0x17e   : > { %v932_v54 = vpop.f32.mrf.mxu3  ;;  %v875_v7 = vadd.f32 %v871_v51, %v812_v63  ;;  %v906_v16 = vpop.f32.mrf.mxu2  ;;  %v849_v28 = vadd.f32 %v845_v4, %v786_v22  ;;  %v1108_v4 = vld [vmem:[#allocation2 + $0x10] sm:$0xff] }
 0x17f   : > { %v937_v58 = vadd.f32 %v932_v54, %v874_v57  ;;  %v911_v29 = vadd.f32 %v906_v16, %v848_v24  ;;  %v1678_v57 = vld [vmem:[%s1082_s0] ss:$0 sm:$0xff] }
 0x185   : > { %v995_v59 = vpop.f32.mrf.mxu1  ;;  %v969_v17 = vpop.f32.mrf.mxu0 }
 0x186   : > { %v1000_v61 = vadd.f32 %v995_v59, %v937_v58  ;;  %v934_v3 = vpop.f32.mrf.mxu3  ;;  %v908_v26 = vpop.f32.mrf.mxu2  ;;  %v974_v33 = vadd.f32 %v969_v17, %v911_v29  ;;  %v1107_v59 = vld [vmem:[#allocation2 + $0x8] sm:$0xff] }
 0x187   : > { %v938_v8 = vadd.f32 %v934_v3, %v875_v7  ;;  %v912_v32 = vadd.f32 %v908_v26, %v849_v28 }
 0x188   : > { %v1509_v0 = vmul.f32 -1.442695, %v1000_v61  ;;  %v1115_v61 = vld [vmem:[#allocation3] sm:$0xff] }
 0x18a   : > { %1679 = vpow2.f32 %v1509_v0 }
 0x18d   : > { %v997_v9 = vpop.f32.mrf.mxu1  ;;  %v971_v31 = vpop.f32.mrf.mxu0 }
 0x18e   : > { %v1001_v11 = vadd.f32 %v997_v9, %v938_v8  ;;  %v975_v35 = vadd.f32 %v971_v31, %v912_v32  ;;  %v1116_v8 = vld [vmem:[#allocation3 + $0x8] sm:$0xff] }
 0x190   : > { %v1680_v12 = vpop.eup %1679  ;;  %v1510_v13 = vmul.f32 -1.442695, %v1001_v11 }
 0x191   : > { %v1010_v14 = vadd.f32 1.0, %v1680_v12 }
 0x192   : > { %1681 = vpow2.f32 %v1510_v13 }
 0x193   : > { %1683 = vrcp.f32 %v1010_v14  ;;  %v1023_v38 = vand.u32 2147483648, %v1010_v14  ;;  %vm1017_vm7 = vweird.f32 %v1010_v14  ;;  %v1021_v39 = vand.u32 2147483647, %v1010_v14 }
 0x195   : > { %v1024_v45 = vor.u32 1.1754944e-38, %v1023_v38  ;;  %vm1022_vm10 = vcmp.eq.f32.partialorder %v1021_v39, 8.507059e+37 }
 0x198   : > { %v1682_v20 = vpop.eup %1681 }
 0x199   : > { %v1684_v21 = vpop.eup %1683  ;;  %v1011_v23 = vadd.f32 1.0, %v1682_v20 }
 0x19a   : > { %v1013_v25 = vmul.f32 %v1684_v21, %v1010_v14  ;;  %vm1018_vm6 = vweird.f32 %v1684_v21 }
 0x19b   : > { %1685 = vrcp.f32 %v1011_v23  ;;  %vm1019_vm8 = vmor %vm1017_vm7, %vm1018_vm6  ;;  %v1038_v41 = vand.u32 2147483648, %v1011_v23  ;;  %v1036_v43 = vand.u32 2147483647, %v1011_v23  ;;  %vm1032_vm11 = vweird.f32 %v1011_v23 }
 0x19c   : > { %v1014_v27 = vsub.f32 1.0, %v1013_v25  ;;  %1687 = vtanh.f32 %v974_v33 }
 0x19d   : > { %1689 = vtanh.f32 %v975_v35  ;;  %v1039_v47 = vor.u32 1.1754944e-38, %v1038_v41  ;;  %vm1037_vm13 = vcmp.eq.f32.partialorder %v1036_v43, 8.507059e+37 }
 0x19e   : > { %v1015_v30 = vmul.f32 %v1684_v21, %v1014_v27 }
 0x1a0   : > { %v1016_v36 = vadd.f32 %v1684_v21, %v1015_v30 }
 0x1a1   : > { %v1686_v34 = vpop.eup %1685 }
 0x1a2   : > { %v1028_v37 = vmul.f32 %v1686_v34, %v1011_v23  ;;  %vm1033_vm9 = vweird.f32 %v1686_v34  ;;  %v1020_v44 = vsel %vm1019_vm8, %v1684_v21, %v1016_v36  ;;  %v1688_v49 = vpop.eup %1687 }
 0x1a3   : > { %vm1034_vm12 = vmor %vm1032_vm11, %vm1033_vm9  ;;  %v1025_v48 = vsel %vm1022_vm10, %v1024_v45, %v1020_v44  ;;  %v1690_v51 = vpop.eup %1689 }
 0x1a4   : > { %v1029_v40 = vsub.f32 1.0, %v1028_v37  ;;  %v1042_v53 = vmul.f32 %v1688_v49, %v1025_v48 }
 0x1a6   : > { %v1030_v42 = vmul.f32 %v1686_v34, %v1029_v40 }
 0x1a8   : > { %v1031_v46 = vadd.f32 %v1686_v34, %v1030_v42 }
 0x1aa   : > { %v1035_v50 = vsel %vm1034_vm12, %v1686_v34, %v1031_v46 }
 0x1ab   : > { %v1040_v52 = vsel %vm1037_vm13, %v1039_v47, %v1035_v50 }
 0x1ac   : > { %v1043_v54 = vmul.f32 %v1690_v51, %v1040_v52 }
 0x1ae   : > { %v1044_v55 = vpack.c.bf16 %v1043_v54, %v1042_v53 }
 0x1b0   : > { %1517 = vmatmul.msk.bf16.vlgmr.msra.gmra.mxu2 %vm704_vm5, %v1044_v55  ;;  %1523 = vmatmul.msk.bf16.vlgmr.msra.gmra.mxu3 %vm704_vm5, %v1044_v55 }
 0x233   : > { %v1073_v58 = vpop.f32.mrf.mxu2  ;;  %v1102_v60 = vpop.f32.mrf.mxu3 }
 0x234   : > { %v1074_v62 = vadd.f32 %v1677_v56, %v1073_v58  ;;  %v1103_v63 = vadd.f32 %v1678_v57, %v1102_v60 }
 0x236   : > { %v1109_v0 = vadd.f32 %v1107_v59, %v1074_v62  ;;  %v1117_v1 = vadd.f32 %v1115_v61, %v1103_v63 }
 0x238   : > { %v1111_v2 = vmul.f32 %v2155_v5, %v1109_v0  ;;  %1119 = vst.msk [vmem:[#allocation3] sm:$0xff] %vm704_vm5, %v1117_v1 }
 0x23a   : > { %1113 = vst.msk [vmem:[#allocation2 + $0x8] sm:$0xff] %vm704_vm5, %v1111_v2 }
 0x23b   : > { %v1075_v3 = vpop.f32.mrf.mxu2  ;;  %v1104_v7 = vpop.f32.mrf.mxu3 }
 0x23c   : > { %v1076_v9 = vadd.f32 %v1677_v56, %v1075_v3  ;;  %v1105_v10 = vadd.f32 %v1678_v57, %v1104_v7 }
 0x23e   : > { %v1110_v11 = vadd.f32 %v1108_v4, %v1076_v9  ;;  %v1118_v12 = vadd.f32 %v1116_v8, %v1105_v10  ;;  %1124 = sbr.rel (%p1524_p4) target bundleno = 843 (0x34b), region = 104 }
 0x240   : > { %v1112_v13 = vmul.f32 %v2157_v6, %v1110_v11  ;;  %1120 = vst.msk [vmem:[#allocation3 + $0x8] sm:$0xff] %vm704_vm5, %v1118_v12 }
 0x242   : > { %1114 = vst.msk [vmem:[#allocation2 + $0x10] sm:$0xff] %vm704_vm5, %v1112_v13 }
 0x243   : > { %v1559_v14 = vld [vmem:[%s2321_s14] sm:$0xff]  ;;  %vm1201_vm14 = vcmask 31744   ;;  %v1190_v42 = vld [vmem:[%s2153_s13 + $0x8] sm:$0xff]  ;;  %vm1212_vm15 = vcmask 64544   ;;  %vm1223_vm0 = vcmask 97344  }
 0x244   : > { %v1560_v15 = vld [vmem:[%s2323_s16] sm:$0xff]  ;;  %1152 = vmatpush.bf16.msra.mxu0 %v1559_v14 }
 0x245   : > { %v1125_v16 = vld [vmem:[#allocation3] sm:$0xff]  ;;  %1180 = vmatpush.bf16.msra.mxu1 %v1560_v15 }
 0x246   : > { %v1127_v18 = vmul.f32 %v2155_v5, %v1125_v16  ;;  %v1691_v21 = vld [vmem:[%s2322_s15] ss:$0 sm:$0xff] }
 0x247   : > { %v1126_v17 = vld [vmem:[#allocation3 + $0x8] sm:$0xff]  ;;  %v1692_v22 = vld [vmem:[%s2368_s4] ss:$0 sm:$0xff] }
 0x248   : > { %v1128_v19 = vmul.f32 %v2157_v6, %v1126_v17  ;;  %v1189_v36 = vld [vmem:[%s2153_s13] sm:$0xff] }
 0x24a   : > { %v1129_v20 = vpack.c.bf16 %v1128_v19, %v1127_v18 }
 0x24c   : > { %1529 = vmatmul.msk.bf16.vlgmr.msra.gmra.mxu0 %vm704_vm5, %v1129_v20  ;;  %1534 = vmatmul.msk.bf16.vlgmr.msra.gmra.mxu1 %vm704_vm5, %v1129_v20 }
 0x2c9   : > { %v1154_v23 = vpop.f32.mrf.mxu0  ;;  %v1182_v24 = vpop.f32.mrf.mxu1 }
 0x2ca   : > { %v1155_v25 = vadd.f32 %v1691_v21, %v1154_v23  ;;  %v1183_v26 = vadd.f32 %v1692_v22, %v1182_v24 }
 0x2cc   : > { %v1159_v27 = vmul.f32 %v2155_v5, %v1155_v25  ;;  %v1187_v28 = vmul.f32 %v2155_v5, %v1183_v26 }
 0x2ce   : > { %v1191_v29 = vmul.f32 1.442695, %v1187_v28  ;;  %1217 = vrot.lane.b32.xlu1 %v1187_v28, %s1926_s20  ;;  %1206 = vrot.lane.b32.xlu0 %v1159_v27, %s1927_s29 }
 0x2d0   : > { %1693 = vpow2.f32 %v1191_v29 }
 0x2d1   : > { %v1156_v30 = vpop.f32.mrf.mxu0  ;;  %v1184_v31 = vpop.f32.mrf.mxu1 }
 0x2d2   : > { %v1157_v32 = vadd.f32 %v1691_v21, %v1156_v30  ;;  %v1185_v33 = vadd.f32 %v1692_v22, %v1184_v31 }
 0x2d4   : > { %v1160_v34 = vmul.f32 %v2157_v6, %v1157_v32  ;;  %v1188_v35 = vmul.f32 %v2157_v6, %v1185_v33 }
 0x2d6   : > { %v1694_v37 = vpop.eup %1693  ;;  %v1193_v38 = vmul.f32 1.442695, %v1188_v35  ;;  %1219 = vrot.lane.b32.xlu1 %v1188_v35, %s1926_s20  ;;  %1208 = vrot.lane.b32.xlu0 %v1160_v34, %s1927_s29 }
 0x2d7   : > { %v1195_v39 = vmul.f32 %v1694_v37, %v1189_v36 }
 0x2d8   : > { %1695 = vpow2.f32 %v1193_v38 }
 0x2d9   : > { %v1197_v40 = vadd.f32 %v1195_v39, %v1159_v27 }
 0x2db   : > { %v1199_v41 = vmul.f32 %v2155_v5, %v1197_v40 }
 0x2dd   : > { %1202 = vst.msk [vmem:[%s2159_s28] sm:$0xff] %vm1201_vm14, %v1199_v41 }
 0x2de   : > { %v1696_v43 = vpop.eup %1695 }
 0x2df   : > { %v1196_v44 = vmul.f32 %v1696_v43, %v1190_v42 }
 0x2e1   : > { %v1198_v45 = vadd.f32 %v1196_v44, %v1160_v34 }
 0x2e3   : > { %v1200_v46 = vmul.f32 %v2157_v6, %v1198_v45 }
 0x2e5   : > { %1203 = vst.msk [vmem:[%s2159_s28 + $0x8] sm:$0xff] %vm1201_vm14, %v1200_v46 }
 0x340   : > { %v1218_v47 = vpop.permute.xlu1 %1217  ;;  %v1207_v48 = vpop.permute.xlu0 %1206 }
 0x341   : > { %1213 = vst.msk [vmem:[%s2159_s28] sm:$0xff] %vm1212_vm15, %v1207_v48 }
 0x342   : > { %1224 = vst.msk [vmem:[%s2159_s28] sm:$0xff] %vm1223_vm0, %v1218_v47 }
 0x348   : > { %v1220_v49 = vpop.permute.xlu1 %1219  ;;  %v1209_v50 = vpop.permute.xlu0 %1208 }
 0x349   : > { %1214 = vst.msk [vmem:[%s2159_s28 + $0x8] sm:$0xff] %vm1212_vm15, %v1209_v50 }
 0x34a   : > { %1225 = vst.msk [vmem:[%s2159_s28 + $0x8] sm:$0xff] %vm1223_vm0, %v1220_v49 }
 0x34b PF: > { %s1561_s27 = sshll.u32 %s1903_s23, 4  ;;  %s2370_s0 = sld [smem:[#allocation35_spill]] }
 0x34c   : > { %s1239_s26 = sshll.u32 %s2159_s28, 4  ;;  %s2371_s30 = sand.u32 1, %s1891_s22   ;;  %s1240_s26 = int_to_ptr.vmem [resolvable:$true] %s1239_s26 }
 0x34d   : > { %s1227_s17 = scalar_lea.sflag [#allocation9], %s2371_s30 }
 0x351   : > { %s1238_s2 = scalar_lea.hbm %s2370_s0, %s1561_s27  ;;  %s1831_s23 = scalar_lea.hbm %s2370_s0, 32 }
 0x352   : > { %s1241_s19 = sshll.u32 %s1238_s2, 4  ;;  %s1242_s19 = int_to_ptr.hbm [resolvable:$true] %s1241_s19 }
 0x353   : > { %s1825_s3 = sshra.s32 %s1242_s19, 4  ;;  %s1826_s3 = int_to_ptr.hbm [resolvable:$true] %s1825_s3 }
 0x354   : > { %s1827_s1 = scalar_lea.hbm %s1826_s3, 16  ;;  %p1832_p8 = scmp.lt.s32.totalorder %s1826_s3, %s2370_s0 }
 0x355   : > { %p1828_p5 = scmp.ne.s32.totalorder %s1826_s3, %s1827_s1  ;;  %p1833_p10 = scmp.lt.s32.totalorder %s1831_s23, %s1827_s1 }
 0x357   : > { %p1829_p6 = pnand %p1828_p5, %p2081_p3  ;;  %p1834_p11 = por %p1833_p10, %p1832_p8 }
 0x359   : > { %p1830_p7 = pneg %p1829_p6 }
 0x35b   : > { %p1835_p12 = pnand %p1834_p11, %p1830_p7 }
 0x35d   : > { %1838 = shalt.err (!%p1835_p12)
}
 0x35e   : > { %s1928_s28 = smov 128   ;;  %s1929_s20 = smov 8  }
 0x35f   : > { %1574 = dma.vmem_to_hbm [thread:$0]  (%p2081_p3), %s1240_s26, 256, %s1242_s19, %s1227_s17, %s1928_s28, %s1928_s28, %s1929_s20  }
 0x360 PF: > { %s2372_s29 = sld [smem:[#allocation22_spill]] }
 0x361   : > { %s2373_s27 = sld [smem:[#allocation18_spill]] }
 0x366   : > { %p1596_p13 = scmp.ge.s32.totalorder %s2372_s29, 2 }
 0x367   : > { %s1256_s18 = sand.u32 1, %s2373_s27  }
 0x368   : > { %p1587_p0 = pnand %p1596_p13, %p2091_p9  ;;  %s1257_s2 = scalar_lea.sflag [#allocation9], %s1256_s18 }
 0x36a   : > { %p1588_p1 = pneg %p1587_p0 }
 0x36c   : > { %1882 = dma.done.wait (%p1588_p1), %s1257_s2, 256  }
 0x36d   : > { %1884 = vsyncadd (%p1588_p1), %s1257_s2, 4294967040  ;;  %s46_s25 = sadd.s32 1, %s2372_s29   ;;  %s2375_s30 = sld [smem:[#allocation19_spill]] }
 0x36e   : > { %p43_p2 = scmp.ge.s32.totalorder %s46_s25, 8   ;;  %s2376_s3 = sld [smem:[#allocation27_spill]] }
 0x36f   : > { %s2377_s1 = sld [smem:[#allocation20_spill]]  ;;  %s2381_s21 = smov %s1891_s22 }
 0x370   : > { %s2378_s23 = sld [smem:[#allocation21_spill]]  ;;  %45 = sbr.rel (!%p43_p2) target bundleno = 28 (0x1c), region = 164 }
 0x371   : > { %s2379_s13 = sld [smem:[#allocation23_spill]] }
 0x372   : > { %s2380_s24 = sld [smem:[#allocation25_spill]] }
 0x373   : > { %s2382_s22 = smov %s2375_s30 }
 0x375   :  { %1263 = vsyncpa [#allocation8], 1 }
 0x376   :  { %1265 = vsyncpa [#allocation8 + $0x1], 1 }
 0x377   :  { %1266 = vsyncpa [#allocation11], 1 }
 0x378   :  { %1267 = vsyncpa [#allocation9], 1 }
 0x379   :  { %1269 = vsyncpa [#allocation9 + $0x1], 1 }

</bundles_post_ra>
